<compile_context>
chip_gen: v6e
topology: v6e:2x2x1
jax: 0.10.0
libtpu: 0.0.40
codegen_flags: <defaults>
</compile_context>

<pallas_src>
import numpy as np
import jax
import jax.numpy as jnp
from jax.experimental import pallas as pl
from jax.experimental.pallas import tpu as pltpu


# =============================================================================
# Kernel
# =============================================================================
def _softmax_temp_kernel(temp_ref, x_ref, o_ref):
    """Row-wise softmax(x / T) for one (tile_rows, D) block.

    temp_ref : (1,) float32 in SMEM   (learnable temperature)
    x_ref    : (tile_rows, D) block in VMEM
    o_ref    : (tile_rows, D) block in VMEM
    """
    x = x_ref[...].astype(jnp.float32)

    # scalar reciprocal of the temperature, splat-multiplied over the block
    inv_t = 1.0 / temp_ref[0]
    s = x * inv_t

    # numerically-stable softmax over the last (lane) axis, fp32 throughout
    m = jnp.max(s, axis=-1, keepdims=True)
    e = jnp.exp(s - m)
    denom = jnp.sum(e, axis=-1, keepdims=True)
    # EUP reciprocal (approx) instead of a per-element divide chain
    o_ref[...] = (e * pl.reciprocal(denom, approx=True)).astype(o_ref.dtype)


# =============================================================================
# Wrapper
# =============================================================================
def softmax_with_temperature(logits, temperature, *, tile_rows=512):
    """softmax(logits / temperature) over the last axis, via a Pallas TPU kernel.

    Works for any rank >= 1: leading dims are folded into the row axis.
    """
    assert tile_rows % 8 == 0, "row tile must respect the (8, 128) sublane rule"

    orig_shape = logits.shape
    D = int(orig_shape[-1])
    R = int(np.prod(orig_shape[:-1])) if len(orig_shape) > 1 else 1
    x2 = logits.reshape(R, D)

    # Pick the row tile: full array if small, else tile_rows (multiple of 8)
    # with zero-padding of the row axis up to a tile multiple.
    if R <= tile_rows:
        tr, Rp = R, R
    else:
        tr = tile_rows
        Rp = ((R + tr - 1) // tr) * tr
        if Rp != R:
            x2 = jnp.pad(x2, ((0, Rp - R), (0, 0)))

    temp = jnp.asarray(temperature, jnp.float32).reshape((1,))

    out = pl.pallas_call(
        _softmax_temp_kernel,
        out_shape=jax.ShapeDtypeStruct((Rp, D), logits.dtype),
        grid=(Rp // tr,),
        in_specs=[
            # scalar temperature parameter -> SMEM, no blocking
            pl.BlockSpec(memory_space=pltpu.MemorySpace.SMEM),
            # (tile_rows, D) row slab; full last dim keeps stores lane-dense
            pl.BlockSpec((tr, D), lambda i: (i, 0)),
        ],
        out_specs=pl.BlockSpec((tr, D), lambda i: (i, 0)),
        compiler_params=pltpu.CompilerParams(
            dimension_semantics=("parallel",)),  # megacore sharding on v7x
    )(temp, x2)

    if Rp != R:
        out = out[:R]
    return out.reshape(orig_shape)


class SoftmaxWithTemperaturePallas:
    """Mirror of the PyTorch module: holds the learnable temperature scalar."""

    def __init__(self, initial_temperature=1.0):
        self.temperature = jnp.float32(initial_temperature)

    def __call__(self, logits):
        return softmax_with_temperature(logits, self.temperature)


# =============================================================================
# Demo / self-check
# =============================================================================
if __name__ == "__main__":
    key = jax.random.PRNGKey(0)
    k1, k2, k3 = jax.random.split(key, 3)

    # --- main check: tiled grid (R = 1024 rows, 2 tiles), lane-dense D = 256 ---
    logits = jax.random.normal(k1, (2, 8, 64, 256), dtype=jnp.float32) * 3.0
    temperature = 0.7
    out = softmax_with_temperature(logits, temperature)
    jax.block_until_ready(out)

    ref = jax.nn.softmax(logits / jnp.float32(temperature), axis=-1)
    assert out.shape == logits.shape
    assert bool(jnp.all(jnp.isfinite(out)))
    assert float(jnp.max(jnp.abs(out - ref))) < 2e-3
    assert float(jnp.max(jnp.abs(jnp.sum(out, axis=-1) - 1.0))) < 2e-3

    # --- small odd shape: single full block (no (8,128) padding needed) -------
    module = SoftmaxWithTemperaturePallas(initial_temperature=1.0)
    logits2 = jax.random.normal(k2, (3, 5, 33), dtype=jnp.float32)
    out2 = module(logits2)
    jax.block_until_ready(out2)
    ref2 = jax.nn.softmax(logits2, axis=-1)
    assert float(jnp.max(jnp.abs(out2 - ref2))) < 2e-3

    # --- ragged row count: exercises zero-pad + slice path (R=650 -> 1024) ----
    logits3 = jax.random.normal(k3, (5, 130, 384), dtype=jnp.float32)
    out3 = softmax_with_temperature(logits3, 2.5)
    jax.block_until_ready(out3)
    ref3 = jax.nn.softmax(logits3 / jnp.float32(2.5), axis=-1)
    assert float(jnp.max(jnp.abs(out3 - ref3))) < 2e-3

    print("KERNEL_OK")
</pallas_src>

<mosaic_0001>
module attributes {stable_mosaic.version = 11 : i64} {
  func.func @_softmax_temp_kernel(%arg0: i32, %arg1: memref<1xf32, #tpu.memory_space<smem>>, %arg2: memref<512x256xf32, #tpu.memory_space<vmem>>, %arg3: memref<512x256xf32, #tpu.memory_space<vmem>>) attributes {dimension_semantics = [#tpu.dimension_semantics<parallel>], iteration_bounds = array<i64: 2>, scalar_prefetch = 0 : i64, scratch_operands = 0 : i64, tpu.core_type = #tpu.core_type<tc>, window_params = [{transform_indices = @transform_0, window_bounds = array<i64: 1>}, {transform_indices = @transform_1, window_bounds = array<i64: 512, 256>}, {transform_indices = @transform_2, window_bounds = array<i64: 512, 256>}]} {
    %c0 = arith.constant 0 : index
    %c0_0 = arith.constant 0 : index
    %0 = vector.load %arg2[%c0, %c0_0] : memref<512x256xf32, #tpu.memory_space<vmem>>, vector<512x256xf32>
    %c0_1 = arith.constant 0 : index
    %1 = memref.load %arg1[%c0_1] : memref<1xf32, #tpu.memory_space<smem>>
    %cst = arith.constant 1.000000e+00 : f32
    %2 = arith.divf %cst, %1 : f32
    %3 = vector.broadcast %2 : f32 to vector<512x256xf32>
    %4 = arith.mulf %0, %3 : vector<512x256xf32>
    %cst_2 = arith.constant dense<0xFF800000> : vector<512xf32>
    %5 = vector.multi_reduction <maximumf>, %4, %cst_2 [1] : vector<512x256xf32> to vector<512xf32>
    %6 = vector.shape_cast %5 : vector<512xf32> to vector<512x1xf32>
    %7 = vector.broadcast %6 : vector<512x1xf32> to vector<512x256xf32>
    %8 = arith.subf %4, %7 : vector<512x256xf32>
    %9 = math.exp %8 : vector<512x256xf32>
    %cst_3 = arith.constant dense<0.000000e+00> : vector<512xf32>
    %10 = vector.multi_reduction <add>, %9, %cst_3 [1] : vector<512x256xf32> to vector<512xf32>
    %11 = vector.shape_cast %10 : vector<512xf32> to vector<512x1xf32>
    %12 = tpu.reciprocal %11 {approx = true} : vector<512x1xf32> -> vector<512x1xf32>
    %13 = vector.broadcast %12 : vector<512x1xf32> to vector<512x256xf32>
    %14 = arith.mulf %9, %13 : vector<512x256xf32>
    %c0_4 = arith.constant 0 : index
    %c0_5 = arith.constant 0 : index
    %15 = vector.load %arg3[%c0_4, %c0_5] : memref<512x256xf32, #tpu.memory_space<vmem>>, vector<512x256xf32>
    tpu.vector_store %arg3[%c0_4, %c0_5], %14 {strides = array<i32>} : memref<512x256xf32, #tpu.memory_space<vmem>>, vector<512x256xf32>,
    return
  }
  func.func @transform_0(%arg0: i32) -> i32 {
    %c0_i32 = arith.constant 0 : i32
    %c0_i32_0 = arith.constant 0 : i32
    return %c0_i32 : i32
  }
  func.func @transform_1(%arg0: i32) -> (i32, i32) {
    %c0_i32 = arith.constant 0 : i32
    %c0_i32_0 = arith.constant 0 : i32
    return %arg0, %c0_i32 : i32, i32
  }
  func.func @transform_2(%arg0: i32) -> (i32, i32) {
    %c0_i32 = arith.constant 0 : i32
    %c0_i32_0 = arith.constant 0 : i32
    return %arg0, %c0_i32 : i32, i32
  }
}

</mosaic_0001>

<bundles_post_ra>
// kernel: tpu_custom_call.1
= control target key start
LH: loop header
LB: loop body
LE: loop exit
PB: predicated region body
PF: predicated region fallthrough
CT: control target
= control target key end

     0   :  { %s3752_s0 = inlined_call_operand.<no memory space> [shape: f32[1], index: 0, kind: input, shape index: {}]   ;;  %s3753_s1 = inlined_call_operand.hbm [shape: f32[1024,256], index: 1, kind: input, shape index: {}]   ;;  %s3754_s2 = inlined_call_operand.hbm [shape: f32[1024,256], index: 2, kind: output, shape index: {}]  }
   0x1   :  { %7 = sst [smem:[#allocation2]] %s3752_s0 }
   0x2   :  { %8 = vsyncpa [#allocation4], 0 }
   0x3   :  { %10 = vsyncpa [#allocation4 + $0x1], 0 }
   0x4   :  { %11 = vsyncpa [#allocation5], 0 }
   0x5   :  { %13 = vsyncpa [#allocation5 + $0x1], 0  ;;  %s2179_s11 = smov 0   ;;  %s2181_s12 = smov 0  }
   0x6   :  { %s2183_s13 = smov 0   ;;  %s2185_s14 = smov 0  }
   0x7 LB: > { %s2200_s0 = sadd.s32 4294967295, %s2153_s14   ;;  %s1603_s15 = sadd.s32 4294967294, %s2153_s14   ;;  %s2153_s14 = sphi %s2185_s14, %s4231_s14   ;;  %s2149_s13 = sphi %s2183_s13, %s4230_s13   ;;  %s2145_s12 = sphi %s2181_s12, %s4229_s12   ;;  %s2141_s11 = sphi %s2179_s11, %s4228_s11  }
   0x8   : > { %s2204_s16 = sadd.s32 1, %s2153_s14   ;;  %s47_s17 = sadd.s32 1, %s2149_s13 }
   0x9   : > { %s44_s18 = ssub.s32 %s2153_s14, %s2204_s16  ;;  %p54_p0 = scmp.ne.s32.totalorder %s2149_s13, %s2145_s12 }
   0xa   : > { %p45_p1 = scmp.eq.s32.totalorder %s44_s18, 0  ;;  %p55_p2 = scmp.eq.s32.totalorder %s2153_s14, 0 }
   0xb   : > { %p60_p3 = scmp.ne.s32.totalorder %s2145_s12, %s2141_s11  ;;  %p61_p4 = scmp.eq.s32.totalorder %s2200_s0, 0 }
   0xc   : > { %s2216_s19 = scalar_select %p45_p1, %s2149_s13, %s47_s17  }
   0xd   : > { %p2218_p5 = por %p55_p2, %p54_p0  ;;  %p2222_p6 = por %p61_p4, %p60_p3 }
   0xe   : > { %p84_p7 = scmp.eq.s32.totalorder %s2200_s0, 1  ;;  %p90_p8 = scmp.eq.s32.totalorder %s1603_s15, 1 }
   0xf   : > { %s3912_s21 = scalar_select %p2222_p6, 1, 0 }
  0x10   : > { %p1637_p10 = scmp.lt.s32.totalorder %s2153_s14, 2  ;;  %p2229_p11 = por %p84_p7, %p54_p0 }
  0x11   : > { %p2233_p12 = por %p90_p8, %p60_p3  ;;  %s113_s24 = sand.u32 1, %s2149_s13  }
  0x12   : > { %s3913_s22 = scalar_select %p2229_p11, 1, 0 }
  0x13   : > { %s3914_s23 = scalar_select %p2233_p12, 1, 0 }
  0x14   : > { %s1620_s25 = sshll.u32 %s2153_s14, 14  ;;  %s1606_s26 = sshll.u32 %s113_s24, 10 }
  0x15   : > { %s2242_s29 = scalar_lea.hbm %s3753_s1, %s1620_s25  ;;  %s117_s30 = scalar_lea.vmem [#allocation3], %s1606_s26 }
  0x16   : > { %s125_s3 = sshll.u32 %s117_s30, 4  ;;  %p2246_p13 = pnand %p1637_p10, %p2218_p5  ;;  %s2250_s3 = int_to_ptr.vmem [resolvable:$true] %s125_s3 }
  0x17   : > { %s2252_s5 = scalar_lea.sflag [#allocation4], %s113_s24  ;;  %s2061_s6 = scalar_lea.hbm %s2242_s29, 16384 }
  0x18   : > { %p2062_p0 = scmp.ne.s32.totalorder %s2242_s29, %s2061_s6  ;;  %p2063_p1 = pneg %p2246_p13 }
  0x19   : > { %s2066_s9 = scalar_lea.hbm %s3753_s1, 32768  ;;  %p2067_p4 = scmp.lt.s32.totalorder %s2242_s29, %s3753_s1 }
  0x1a   : > { %p2064_p2 = pnand %p2063_p1, %p2062_p0  ;;  %p2068_p5 = scmp.lt.s32.totalorder %s2066_s9, %s2061_s6 }
  0x1c   : > { %p2065_p3 = pneg %p2064_p2  ;;  %p2069_p7 = por %p2068_p5, %p2067_p4 }
  0x1e   : > { %p2070_p8 = pnand %p2069_p7, %p2065_p3 }
  0x20   : > { %2073 = shalt.err (!%p2070_p8)
}
  0x21   : > { %s2074_s17 = scalar_lea.vmem %s2250_s3, 16384  ;;  %s2155_s18 = smov [#allocation3]  }
  0x22   : > { %p2075_p10 = scmp.ne.s32.totalorder %s2250_s3, %s2074_s17  ;;  %s2079_s20 = sshll.u32 %s2155_s18, 4  ;;  %s2080_s20 = int_to_ptr.vmem [resolvable:$false] %s2079_s20 }
  0x23   : > { %s2081_s24 = scalar_lea.vmem %s2080_s20, 32768  ;;  %p2082_p2 = scmp.lt.s32.totalorder %s2250_s3, %s2080_s20 }
  0x24   : > { %p2077_p9 = pnand %p2075_p10, %p2063_p1  ;;  %p2083_p12 = scmp.lt.s32.totalorder %s2081_s24, %s2074_s17 }
  0x26   : > { %p2078_p0 = pneg %p2077_p9  ;;  %p2084_p11 = por %p2083_p12, %p2082_p2 }
  0x28   : > { %p2085_p6 = pnand %p2084_p11, %p2078_p0 }
  0x2a   : > { %2088 = shalt.err (!%p2085_p6)
}
  0x2b   : > { %s2156_s25 = smov 256   ;;  %s2157_s26 = smov 16  }
  0x2c   : > { %1632 = dma.hbm_to_vmem [thread:$0]  (!%p2246_p13), %s2242_s29, 16384, %s2250_s3, %s2252_s5, %s2156_s25, %s2156_s25, %s2157_s26  }
  0x2d   : > { %p1610_p9 = scmp.ge.s32.totalorder %s2153_s14, 1  ;;  %p133_p1 = scmp.lt.s32.totalorder %s2153_s14, 3 }
  0x2f   : > { %p134_p3 = pnand %p1610_p9, %p133_p1 }
  0x31   : > { %137 = sbr.rel (%p134_p3) target bundleno = 591 (0x24f), region = 28 }
  0x36   : > { %s2276_s27 = sand.u32 1, %s2145_s12   ;;  %p3916_p6 = scmp.ne.s32.totalorder %s3912_s21, 0 }
  0x37   : > { %s1611_s28 = sshll.u32 %s2276_s27, 10  ;;  %s140_s30 = scalar_lea.sflag [#allocation4], %s2276_s27 }
  0x38   : > { %s2282_s6 = scalar_lea.vmem [#allocation3], %s1611_s28 }
  0x39   : > { %2132 = dma.done.wait (%p3916_p6), %s140_s30, 16384  }
  0x3a   : > { %2134 = vsyncadd (%p3916_p6), %s140_s30, 4294950912  ;;  %s294_s29 = sld [smem:[#allocation2]]  ;;  %v170_v2 = vld [vmem:[%s2282_s6 + $0x20] sm:$0xff]  ;;  %v171_v3 = vld [vmem:[%s2282_s6 + $0x28] sm:$0xff]  ;;  %s3446_s21 = scalar_lea.vmem [#allocation6], %s1611_s28 }
  0x3b   : > { %v166_v4 = vld [vmem:[%s2282_s6] sm:$0xff]  ;;  %v167_v5 = vld [vmem:[%s2282_s6 + $0x8] sm:$0xff]  ;;  %v172_v6 = vld [vmem:[%s2282_s6 + $0x30] sm:$0xff]  ;;  %s1622_s4 = sshll.u32 %s2200_s0, 14  ;;  %s1530_s5 = sshll.u32 %s3446_s21, 4  ;;  %s3705_s5 = int_to_ptr.vmem [resolvable:$true] %s1530_s5 }
  0x3c   : > { %v173_v7 = vld [vmem:[%s2282_s6 + $0x38] sm:$0xff]  ;;  %v168_v9 = vld [vmem:[%s2282_s6 + $0x10] sm:$0xff]  ;;  %v174_v23 = vld [vmem:[%s2282_s6 + $0x40] sm:$0xff]  ;;  %s3703_s9 = scalar_lea.hbm %s3754_s2, %s1622_s4  ;;  %s1516_s0 = scalar_lea.sflag [#allocation5], %s2276_s27 }
  0x3d   : > { %v169_v10 = vld [vmem:[%s2282_s6 + $0x18] sm:$0xff]  ;;  %v176_v21 = vld [vmem:[%s2282_s6 + $0x50] sm:$0xff]  ;;  %v175_v24 = vld [vmem:[%s2282_s6 + $0x48] sm:$0xff]  ;;  %s2089_s10 = scalar_lea.vmem %s3705_s5, 16384  ;;  %p4225_p12 = scmp.ne.s32.totalorder %s3913_s22, 0 }
  0x3e   : > { %v177_v22 = vld [vmem:[%s2282_s6 + $0x58] sm:$0xff]  ;;  %v180_v31 = vld [vmem:[%s2282_s6 + $0x70] sm:$0xff]  ;;  %v178_v33 = vld [vmem:[%s2282_s6 + $0x60] sm:$0xff]  ;;  %p2090_p11 = scmp.ne.s32.totalorder %s3705_s5, %s2089_s10  ;;  %s2158_s15 = smov [#allocation6]  }
  0x3f   : > { %v181_v32 = vld [vmem:[%s2282_s6 + $0x78] sm:$0xff]  ;;  %v179_v34 = vld [vmem:[%s2282_s6 + $0x68] sm:$0xff]  ;;  %v184_v41 = vld [vmem:[%s2282_s6 + $0x90] sm:$0xff]  ;;  %s2093_s17 = sshll.u32 %s2158_s15, 4  ;;  %s2094_s17 = int_to_ptr.vmem [resolvable:$false] %s2093_s17 }
  0x40   : > { %v295_v0 = vstv %s294_s29  ;;  %v185_v42 = vld [vmem:[%s2282_s6 + $0x98] sm:$0xff]  ;;  %v182_v43 = vld [vmem:[%s2282_s6 + $0x80] sm:$0xff]  ;;  %v183_v44 = vld [vmem:[%s2282_s6 + $0x88] sm:$0xff]  ;;  %p2091_p13 = pnand %p2090_p11, %p4225_p12  ;;  %s2095_s18 = scalar_lea.vmem %s2094_s17, 32768 }
  0x41   : > { %1675 = vrcp.f32 %v295_v0  ;;  %v188_v51 = vld [vmem:[%s2282_s6 + $0xb0] sm:$0xff]  ;;  %v189_v52 = vld [vmem:[%s2282_s6 + $0xb8] sm:$0xff]  ;;  %v186_v53 = vld [vmem:[%s2282_s6 + $0xa0] sm:$0xff]  ;;  %p2096_p5 = scmp.lt.s32.totalorder %s3705_s5, %s2094_s17  ;;  %p2097_p7 = scmp.lt.s32.totalorder %s2095_s18, %s2089_s10 }
  0x42   : > { %v187_v54 = vld [vmem:[%s2282_s6 + $0xa8] sm:$0xff]  ;;  %v192_v61 = vld [vmem:[%s2282_s6 + $0xd0] sm:$0xff]  ;;  %v193_v62 = vld [vmem:[%s2282_s6 + $0xd8] sm:$0xff]  ;;  %p2092_p4 = pneg %p2091_p13 }
  0x43   : > { %v190_v63 = vld [vmem:[%s2282_s6 + $0xc0] sm:$0xff]  ;;  %v191_v0 = vld [vmem:[%s2282_s6 + $0xc8] sm:$0xff]  ;;  %p2098_p8 = por %p2097_p7, %p2096_p5 }
  0x45   : > { %p2099_p10 = pnand %p2098_p8, %p2092_p4 }
  0x4e   : > { %v1676_v1 = vpop.eup %1675 }
  0x4f   : > { %1623 = vpush %v1676_v1 }
  0x80   : > { %s1624_s3 = spop %1623 }
  0x81   : > { %v2294_v8 = vstv %s1624_s3 }
  0x82   : > { %v2299_v11 = vmul.f32 %v2294_v8, %v170_v2  ;;  %v2302_v12 = vmul.f32 %v2294_v8, %v171_v3  ;;  %v2305_v13 = vmul.f32 %v2294_v8, %v166_v4  ;;  %v2308_v14 = vmul.f32 %v2294_v8, %v167_v5 }
  0x83   : > { %v2311_v15 = vmul.f32 %v2294_v8, %v172_v6  ;;  %v2314_v16 = vmul.f32 %v2294_v8, %v173_v7  ;;  %v2321_v19 = vmul.f32 %v2294_v8, %v168_v9  ;;  %v2324_v20 = vmul.f32 %v2294_v8, %v169_v10  ;;  %v196_v7 = vld [vmem:[%s2282_s6 + $0xf0] sm:$0xff]  ;;  %v197_v9 = vld [vmem:[%s2282_s6 + $0xf8] sm:$0xff]  ;;  %v194_v10 = vld [vmem:[%s2282_s6 + $0xe0] sm:$0xff] }
  0x84   : > { %v433_v17 = vmax.f32 %v2299_v11, %v2302_v12  ;;  %v427_v18 = vmax.f32 %v2305_v13, %v2308_v14  ;;  %v2331_v25 = vmul.f32 %v2294_v8, %v176_v21  ;;  %v2334_v26 = vmul.f32 %v2294_v8, %v177_v22 }
  0x85   : > { %v436_v27 = vmax.f32 %v2311_v15, %v2314_v16  ;;  %v430_v28 = vmax.f32 %v2321_v19, %v2324_v20  ;;  %v2341_v29 = vmul.f32 %v2294_v8, %v174_v23  ;;  %v2344_v30 = vmul.f32 %v2294_v8, %v175_v24 }
  0x86   : > { %434 = vmax.xlane.f32.xlu1 %v433_v17  ;;  %428 = vmax.xlane.f32.xlu0 %v427_v18  ;;  %v2351_v35 = vmul.f32 %v2294_v8, %v180_v31  ;;  %v2354_v36 = vmul.f32 %v2294_v8, %v181_v32  ;;  %v442_v37 = vmax.f32 %v2331_v25, %v2334_v26  ;;  %v195_v17 = vld [vmem:[%s2282_s6 + $0xe8] sm:$0xff]  ;;  %v201_v31 = vld [vmem:[%s2282_s6 + $0x118] sm:$0xff]  ;;  %v198_v32 = vld [vmem:[%s2282_s6 + $0x100] sm:$0xff] }
  0x87   : > { %v439_v38 = vmax.f32 %v2341_v29, %v2344_v30  ;;  %v2361_v39 = vmul.f32 %v2294_v8, %v178_v33  ;;  %v2364_v40 = vmul.f32 %v2294_v8, %v179_v34  ;;  %v2373_v46 = vmul.f32 %v2294_v8, %v184_v41  ;;  %v199_v33 = vld [vmem:[%s2282_s6 + $0x108] sm:$0xff] }
  0x88   : > { %v448_v45 = vmax.f32 %v2351_v35, %v2354_v36  ;;  %v2378_v48 = vmul.f32 %v2294_v8, %v185_v42  ;;  %v2381_v49 = vmul.f32 %v2294_v8, %v182_v43  ;;  %v2384_v50 = vmul.f32 %v2294_v8, %v183_v44  ;;  %v204_v44 = vld [vmem:[%s2282_s6 + $0x130] sm:$0xff] }
  0x89   : > { %v445_v47 = vmax.f32 %v2361_v39, %v2364_v40  ;;  %v2391_v55 = vmul.f32 %v2294_v8, %v188_v51  ;;  %v2394_v56 = vmul.f32 %v2294_v8, %v189_v52  ;;  %v2401_v59 = vmul.f32 %v2294_v8, %v186_v53  ;;  %v203_v51 = vld [vmem:[%s2282_s6 + $0x128] sm:$0xff] }
  0x8a   : > { %437 = vmax.xlane.f32.xlu1 %v436_v27  ;;  %431 = vmax.xlane.f32.xlu0 %v430_v28  ;;  %v454_v57 = vmax.f32 %v2373_v46, %v2378_v48  ;;  %v451_v58 = vmax.f32 %v2381_v49, %v2384_v50  ;;  %v2404_v60 = vmul.f32 %v2294_v8, %v187_v54  ;;  %v200_v28 = vld [vmem:[%s2282_s6 + $0x110] sm:$0xff] }
  0x8b   : > { %v460_v1 = vmax.f32 %v2391_v55, %v2394_v56  ;;  %v2413_v2 = vmul.f32 %v2294_v8, %v192_v61  ;;  %v2418_v4 = vmul.f32 %v2294_v8, %v193_v62  ;;  %v2421_v5 = vmul.f32 %v2294_v8, %v190_v63  ;;  %v208_v62 = vld [vmem:[%s2282_s6 + $0x150] sm:$0xff]  ;;  %v209_v63 = vld [vmem:[%s2282_s6 + $0x158] sm:$0xff] }
  0x8c   : > { %v457_v3 = vmax.f32 %v2401_v59, %v2404_v60  ;;  %v2424_v6 = vmul.f32 %v2294_v8, %v191_v0  ;;  %v2431_v18 = vmul.f32 %v2294_v8, %v196_v7  ;;  %v2434_v21 = vmul.f32 %v2294_v8, %v197_v9  ;;  %v206_v0 = vld [vmem:[%s2282_s6 + $0x140] sm:$0xff] }
  0x8d   : > { %v466_v22 = vmax.f32 %v2413_v2, %v2418_v4  ;;  %v2441_v24 = vmul.f32 %v2294_v8, %v194_v10  ;;  %v2444_v27 = vmul.f32 %v2294_v8, %v195_v17  ;;  %v2451_v34 = vmul.f32 %v2294_v8, %v200_v28  ;;  %v213_v28 = vld [vmem:[%s2282_s6 + $0x178] sm:$0xff] }
  0x8e   : > { %443 = vmax.xlane.f32.xlu1 %v442_v37  ;;  %440 = vmax.xlane.f32.xlu0 %v439_v38  ;;  %v463_v23 = vmax.f32 %v2421_v5, %v2424_v6  ;;  %v2454_v37 = vmul.f32 %v2294_v8, %v201_v31  ;;  %v472_v38 = vmax.f32 %v2431_v18, %v2434_v21  ;;  %v210_v31 = vld [vmem:[%s2282_s6 + $0x160] sm:$0xff] }
  0x8f   : > { %v469_v41 = vmax.f32 %v2441_v24, %v2444_v27  ;;  %v2461_v42 = vmul.f32 %v2294_v8, %v198_v32  ;;  %v2464_v43 = vmul.f32 %v2294_v8, %v199_v33  ;;  %v2473_v53 = vmul.f32 %v2294_v8, %v204_v44  ;;  %v211_v32 = vld [vmem:[%s2282_s6 + $0x168] sm:$0xff] }
  0x90   : > { %v478_v52 = vmax.f32 %v2451_v34, %v2454_v37  ;;  %v2484_v61 = vmul.f32 %v2294_v8, %v203_v51  ;;  %v2494_v7 = vmul.f32 %v2294_v8, %v209_v63  ;;  %v2501_v17 = vmul.f32 %v2294_v8, %v206_v0  ;;  %v216_v51 = vld [vmem:[%s2282_s6 + $0x190] sm:$0xff] }
  0x91   : > { %v475_v54 = vmax.f32 %v2461_v42, %v2464_v43  ;;  %v2518_v44 = vmul.f32 %v2294_v8, %v213_v28  ;;  %v2531_v63 = vmul.f32 %v2294_v8, %v216_v51  ;;  %v220_v28 = vld [vmem:[%s2282_s6 + $0x1b0] sm:$0xff] }
  0x92   : > { %449 = vmax.xlane.f32.xlu1 %v448_v45  ;;  %446 = vmax.xlane.f32.xlu0 %v445_v47  ;;  %v205_v45 = vld [vmem:[%s2282_s6 + $0x138] sm:$0xff]  ;;  %v202_v47 = vld [vmem:[%s2282_s6 + $0x120] sm:$0xff] }
  0x93   : > { %3919 = vst [vmem:[#allocation11_spill] sm:$0xff] %v2531_v63 }
  0x96   : > { %455 = vmax.xlane.f32.xlu1 %v454_v57  ;;  %452 = vmax.xlane.f32.xlu0 %v451_v58  ;;  %v2478_v57 = vmul.f32 %v2294_v8, %v205_v45  ;;  %v2481_v58 = vmul.f32 %v2294_v8, %v202_v47  ;;  %v2521_v45 = vmul.f32 %v2294_v8, %v210_v31  ;;  %v221_v31 = vld [vmem:[%s2282_s6 + $0x1b8] sm:$0xff] }
  0x97   : > { %v2524_v47 = vmul.f32 %v2294_v8, %v211_v32  ;;  %v218_v32 = vld [vmem:[%s2282_s6 + $0x1a0] sm:$0xff]  ;;  %v2554_v51 = vmul.f32 %v2294_v8, %v221_v31 }
  0x98   : > { %v484_v9 = vmax.f32 %v2473_v53, %v2478_v57  ;;  %v481_v10 = vmax.f32 %v2481_v58, %v2484_v61  ;;  %3917 = vst [vmem:[#allocation9_spill] sm:$0xff] %v2521_v45  ;;  %v222_v31 = vld [vmem:[%s2282_s6 + $0x1c0] sm:$0xff] }
  0x99   : > { %3918 = vst [vmem:[#allocation10_spill] sm:$0xff] %v2524_v47  ;;  %3924 = vst [vmem:[#allocation16_spill] sm:$0xff] %v2554_v51 }
  0x9a   : > { %461 = vmax.xlane.f32.xlu1 %v460_v1  ;;  %458 = vmax.xlane.f32.xlu0 %v457_v3  ;;  %v207_v1 = vld [vmem:[%s2282_s6 + $0x148] sm:$0xff]  ;;  %v2491_v3 = vmul.f32 %v2294_v8, %v208_v62 }
  0x9b   : > { %v215_v62 = vld [vmem:[%s2282_s6 + $0x188] sm:$0xff] }
  0x9c   : > { %v490_v33 = vmax.f32 %v2491_v3, %v2494_v7 }
  0x9e   : > { %467 = vmax.xlane.f32.xlu1 %v466_v22  ;;  %464 = vmax.xlane.f32.xlu0 %v463_v23  ;;  %v2504_v22 = vmul.f32 %v2294_v8, %v207_v1  ;;  %v212_v23 = vld [vmem:[%s2282_s6 + $0x170] sm:$0xff] }
  0xa2   : > { %473 = vmax.xlane.f32.xlu1 %v472_v38  ;;  %470 = vmax.xlane.f32.xlu0 %v469_v41  ;;  %v2513_v38 = vmul.f32 %v2294_v8, %v212_v23  ;;  %v487_v41 = vmax.f32 %v2501_v17, %v2504_v22  ;;  %v2544_v23 = vmul.f32 %v2294_v8, %v215_v62 }
  0xa3   : > { %v2561_v62 = vmul.f32 %v2294_v8, %v218_v32 }
  0xa4   : > { %v496_v1 = vmax.f32 %v2513_v38, %v2518_v44  ;;  %3922 = vst [vmem:[#allocation14_spill] sm:$0xff] %v2544_v23 }
  0xa5   : > { %3925 = vst [vmem:[#allocation17_spill] sm:$0xff] %v2561_v62 }
  0xa6   : > { %479 = vmax.xlane.f32.xlu1 %v478_v52  ;;  %476 = vmax.xlane.f32.xlu0 %v475_v54  ;;  %v217_v52 = vld [vmem:[%s2282_s6 + $0x198] sm:$0xff]  ;;  %v214_v54 = vld [vmem:[%s2282_s6 + $0x180] sm:$0xff] }
  0xa7   : > { %v2534_v0 = vmul.f32 %v2294_v8, %v217_v52 }
  0xa9   : > { %3920 = vst [vmem:[#allocation12_spill] sm:$0xff] %v2534_v0  ;;  %v502_v52 = vmax.f32 %v2531_v63, %v2534_v0  ;;  %v231_v63 = vld [vmem:[%s2282_s6 + $0x208] sm:$0xff] }
  0xaa   : > { %485 = vmax.xlane.f32.xlu1 %v484_v9  ;;  %482 = vmax.xlane.f32.xlu0 %v481_v10  ;;  %v493_v9 = vmax.f32 %v2521_v45, %v2524_v47  ;;  %v2541_v10 = vmul.f32 %v2294_v8, %v214_v54  ;;  %v223_v47 = vld [vmem:[%s2282_s6 + $0x1c8] sm:$0xff]  ;;  %v290_v45 = vld [vmem:[%s2282_s6 + $0x3e0] sm:$0xff] }
  0xac   : > { %3921 = vst [vmem:[#allocation13_spill] sm:$0xff] %v2541_v10  ;;  %v499_v54 = vmax.f32 %v2541_v10, %v2544_v23  ;;  %v2581_v10 = vmul.f32 %v2294_v8, %v222_v31 }
  0xae   : > { %491 = vmax.xlane.f32.xlu1 %v490_v33  ;;  %488 = vmax.xlane.f32.xlu0 %v487_v41  ;;  %v219_v33 = vld [vmem:[%s2282_s6 + $0x1a8] sm:$0xff]  ;;  %v2551_v41 = vmul.f32 %v2294_v8, %v220_v28  ;;  %v225_v28 = vld [vmem:[%s2282_s6 + $0x1d8] sm:$0xff]  ;;  %3929 = vst [vmem:[#allocation21_spill] sm:$0xff] %v2581_v10 }
  0xb0   : > { %3923 = vst [vmem:[#allocation15_spill] sm:$0xff] %v2551_v41  ;;  %v508_v0 = vmax.f32 %v2551_v41, %v2554_v51  ;;  %v229_v51 = vld [vmem:[%s2282_s6 + $0x1f8] sm:$0xff]  ;;  %v227_v41 = vld [vmem:[%s2282_s6 + $0x1e8] sm:$0xff] }
  0xb2   : > { %497 = vmax.xlane.f32.xlu1 %v496_v1  ;;  %494 = vmax.xlane.f32.xlu0 %v493_v9  ;;  %v2564_v1 = vmul.f32 %v2294_v8, %v219_v33  ;;  %v224_v9 = vld [vmem:[%s2282_s6 + $0x1d0] sm:$0xff]  ;;  %v2578_v33 = vmul.f32 %v2294_v8, %v225_v28  ;;  %v2594_v28 = vmul.f32 %v2294_v8, %v229_v51  ;;  %v230_v51 = vld [vmem:[%s2282_s6 + $0x200] sm:$0xff] }
  0xb3   : > { %v2573_v23 = vmul.f32 %v2294_v8, %v224_v9  ;;  %v226_v9 = vld [vmem:[%s2282_s6 + $0x1e0] sm:$0xff] }
  0xb4   : > { %3926 = vst [vmem:[#allocation18_spill] sm:$0xff] %v2564_v1  ;;  %v505_v32 = vmax.f32 %v2561_v62, %v2564_v1  ;;  %3928 = vst [vmem:[#allocation20_spill] sm:$0xff] %v2578_v33  ;;  %v2601_v62 = vmul.f32 %v2294_v8, %v226_v9 }
  0xb5   : > { %3927 = vst [vmem:[#allocation19_spill] sm:$0xff] %v2573_v23  ;;  %3932 = vst [vmem:[#allocation24_spill] sm:$0xff] %v2594_v28  ;;  %v514_v31 = vmax.f32 %v2573_v23, %v2578_v33  ;;  %v239_v23 = vld [vmem:[%s2282_s6 + $0x248] sm:$0xff] }
  0xb6   : > { %503 = vmax.xlane.f32.xlu1 %v502_v52  ;;  %500 = vmax.xlane.f32.xlu0 %v499_v54  ;;  %v2584_v52 = vmul.f32 %v2294_v8, %v223_v47  ;;  %v228_v54 = vld [vmem:[%s2282_s6 + $0x1f0] sm:$0xff]  ;;  %3933 = vst [vmem:[#allocation25_spill] sm:$0xff] %v2601_v62 }
  0xb7   : > { %v2591_v1 = vmul.f32 %v2294_v8, %v228_v54  ;;  %v233_v54 = vld [vmem:[%s2282_s6 + $0x218] sm:$0xff] }
  0xb8   : > { %3930 = vst [vmem:[#allocation22_spill] sm:$0xff] %v2584_v52  ;;  %v511_v47 = vmax.f32 %v2581_v10, %v2584_v52  ;;  %v2621_v10 = vmul.f32 %v2294_v8, %v230_v51 }
  0xb9   : > { %3931 = vst [vmem:[#allocation23_spill] sm:$0xff] %v2591_v1  ;;  %v520_v33 = vmax.f32 %v2591_v1, %v2594_v28  ;;  %v237_v28 = vld [vmem:[%s2282_s6 + $0x238] sm:$0xff]  ;;  %v235_v1 = vld [vmem:[%s2282_s6 + $0x228] sm:$0xff] }
  0xba   : > { %509 = vmax.xlane.f32.xlu1 %v508_v0  ;;  %506 = vmax.xlane.f32.xlu0 %v505_v32  ;;  %v2604_v0 = vmul.f32 %v2294_v8, %v227_v41  ;;  %v232_v32 = vld [vmem:[%s2282_s6 + $0x210] sm:$0xff]  ;;  %v2618_v41 = vmul.f32 %v2294_v8, %v233_v54  ;;  %3937 = vst [vmem:[#allocation29_spill] sm:$0xff] %v2621_v10 }
  0xbb   : > { %v2613_v52 = vmul.f32 %v2294_v8, %v232_v32  ;;  %v234_v32 = vld [vmem:[%s2282_s6 + $0x220] sm:$0xff]  ;;  %v2634_v54 = vmul.f32 %v2294_v8, %v237_v28 }
  0xbc   : > { %3934 = vst [vmem:[#allocation26_spill] sm:$0xff] %v2604_v0  ;;  %v517_v9 = vmax.f32 %v2601_v62, %v2604_v0  ;;  %3936 = vst [vmem:[#allocation28_spill] sm:$0xff] %v2618_v41  ;;  %v2641_v62 = vmul.f32 %v2294_v8, %v234_v32  ;;  %v238_v28 = vld [vmem:[%s2282_s6 + $0x240] sm:$0xff] }
  0xbd   : > { %3935 = vst [vmem:[#allocation27_spill] sm:$0xff] %v2613_v52  ;;  %3940 = vst [vmem:[#allocation32_spill] sm:$0xff] %v2634_v54  ;;  %v526_v51 = vmax.f32 %v2613_v52, %v2618_v41  ;;  %v243_v52 = vld [vmem:[%s2282_s6 + $0x268] sm:$0xff] }
  0xbe   : > { %515 = vmax.xlane.f32.xlu1 %v514_v31  ;;  %512 = vmax.xlane.f32.xlu0 %v511_v47  ;;  %v2624_v31 = vmul.f32 %v2294_v8, %v231_v63  ;;  %v236_v47 = vld [vmem:[%s2282_s6 + $0x230] sm:$0xff]  ;;  %3941 = vst [vmem:[#allocation33_spill] sm:$0xff] %v2641_v62 }
  0xbf   : > { %v2631_v0 = vmul.f32 %v2294_v8, %v236_v47  ;;  %v241_v47 = vld [vmem:[%s2282_s6 + $0x258] sm:$0xff] }
  0xc0   : > { %3938 = vst [vmem:[#allocation30_spill] sm:$0xff] %v2624_v31  ;;  %v523_v63 = vmax.f32 %v2621_v10, %v2624_v31  ;;  %v2654_v31 = vmul.f32 %v2294_v8, %v241_v47  ;;  %v2661_v10 = vmul.f32 %v2294_v8, %v238_v28  ;;  %v242_v47 = vld [vmem:[%s2282_s6 + $0x260] sm:$0xff] }
  0xc1   : > { %3939 = vst [vmem:[#allocation31_spill] sm:$0xff] %v2631_v0  ;;  %v532_v32 = vmax.f32 %v2631_v0, %v2634_v54  ;;  %v251_v0 = vld [vmem:[%s2282_s6 + $0x2a8] sm:$0xff] }
  0xc2   : > { %521 = vmax.xlane.f32.xlu1 %v520_v33  ;;  %518 = vmax.xlane.f32.xlu0 %v517_v9  ;;  %v2644_v33 = vmul.f32 %v2294_v8, %v235_v1  ;;  %v240_v9 = vld [vmem:[%s2282_s6 + $0x250] sm:$0xff]  ;;  %3944 = vst [vmem:[#allocation36_spill] sm:$0xff] %v2654_v31  ;;  %3945 = vst [vmem:[#allocation37_spill] sm:$0xff] %v2661_v10 }
  0xc3   : > { %v2651_v41 = vmul.f32 %v2294_v8, %v240_v9  ;;  %v245_v9 = vld [vmem:[%s2282_s6 + $0x278] sm:$0xff] }
  0xc4   : > { %3942 = vst [vmem:[#allocation34_spill] sm:$0xff] %v2644_v33  ;;  %v529_v1 = vmax.f32 %v2641_v62, %v2644_v33  ;;  %v2681_v62 = vmul.f32 %v2294_v8, %v242_v47 }
  0xc5   : > { %3943 = vst [vmem:[#allocation35_spill] sm:$0xff] %v2651_v41  ;;  %v538_v54 = vmax.f32 %v2651_v41, %v2654_v31  ;;  %v249_v31 = vld [vmem:[%s2282_s6 + $0x298] sm:$0xff]  ;;  %v247_v41 = vld [vmem:[%s2282_s6 + $0x288] sm:$0xff] }
  0xc6   : > { %527 = vmax.xlane.f32.xlu1 %v526_v51  ;;  %524 = vmax.xlane.f32.xlu0 %v523_v63  ;;  %v2664_v51 = vmul.f32 %v2294_v8, %v239_v23  ;;  %v244_v63 = vld [vmem:[%s2282_s6 + $0x270] sm:$0xff]  ;;  %v2678_v23 = vmul.f32 %v2294_v8, %v245_v9  ;;  %3949 = vst [vmem:[#allocation41_spill] sm:$0xff] %v2681_v62 }
  0xc7   : > { %v2673_v33 = vmul.f32 %v2294_v8, %v244_v63  ;;  %v246_v63 = vld [vmem:[%s2282_s6 + $0x280] sm:$0xff]  ;;  %v2694_v9 = vmul.f32 %v2294_v8, %v249_v31 }
  0xc8   : > { %3946 = vst [vmem:[#allocation38_spill] sm:$0xff] %v2664_v51  ;;  %v535_v28 = vmax.f32 %v2661_v10, %v2664_v51  ;;  %3948 = vst [vmem:[#allocation40_spill] sm:$0xff] %v2678_v23  ;;  %v2701_v10 = vmul.f32 %v2294_v8, %v246_v63  ;;  %v250_v31 = vld [vmem:[%s2282_s6 + $0x2a0] sm:$0xff] }
  0xc9   : > { %3947 = vst [vmem:[#allocation39_spill] sm:$0xff] %v2673_v33  ;;  %3952 = vst [vmem:[#allocation44_spill] sm:$0xff] %v2694_v9  ;;  %v544_v47 = vmax.f32 %v2673_v33, %v2678_v23  ;;  %v259_v33 = vld [vmem:[%s2282_s6 + $0x2e8] sm:$0xff] }
  0xca   : > { %533 = vmax.xlane.f32.xlu1 %v532_v32  ;;  %530 = vmax.xlane.f32.xlu0 %v529_v1  ;;  %v2684_v32 = vmul.f32 %v2294_v8, %v243_v52  ;;  %v248_v1 = vld [vmem:[%s2282_s6 + $0x290] sm:$0xff]  ;;  %3953 = vst [vmem:[#allocation45_spill] sm:$0xff] %v2701_v10 }
  0xcb   : > { %v2691_v51 = vmul.f32 %v2294_v8, %v248_v1  ;;  %v253_v1 = vld [vmem:[%s2282_s6 + $0x2b8] sm:$0xff] }
  0xcc   : > { %3950 = vst [vmem:[#allocation42_spill] sm:$0xff] %v2684_v32  ;;  %v541_v52 = vmax.f32 %v2681_v62, %v2684_v32  ;;  %v2721_v62 = vmul.f32 %v2294_v8, %v250_v31 }
  0xcd   : > { %3951 = vst [vmem:[#allocation43_spill] sm:$0xff] %v2691_v51  ;;  %v550_v23 = vmax.f32 %v2691_v51, %v2694_v9  ;;  %v257_v9 = vld [vmem:[%s2282_s6 + $0x2d8] sm:$0xff]  ;;  %v255_v51 = vld [vmem:[%s2282_s6 + $0x2c8] sm:$0xff] }
  0xce   : > { %539 = vmax.xlane.f32.xlu1 %v538_v54  ;;  %536 = vmax.xlane.f32.xlu0 %v535_v28  ;;  %v2704_v54 = vmul.f32 %v2294_v8, %v247_v41  ;;  %v252_v28 = vld [vmem:[%s2282_s6 + $0x2b0] sm:$0xff]  ;;  %v2718_v41 = vmul.f32 %v2294_v8, %v253_v1  ;;  %3957 = vst [vmem:[#allocation49_spill] sm:$0xff] %v2721_v62 }
  0xcf   : > { %v2713_v32 = vmul.f32 %v2294_v8, %v252_v28  ;;  %v254_v28 = vld [vmem:[%s2282_s6 + $0x2c0] sm:$0xff]  ;;  %v2734_v1 = vmul.f32 %v2294_v8, %v257_v9 }
  0xd0   : > { %3954 = vst [vmem:[#allocation46_spill] sm:$0xff] %v2704_v54  ;;  %v547_v63 = vmax.f32 %v2701_v10, %v2704_v54  ;;  %3956 = vst [vmem:[#allocation48_spill] sm:$0xff] %v2718_v41  ;;  %v2741_v10 = vmul.f32 %v2294_v8, %v254_v28  ;;  %v258_v9 = vld [vmem:[%s2282_s6 + $0x2e0] sm:$0xff] }
  0xd1   : > { %3955 = vst [vmem:[#allocation47_spill] sm:$0xff] %v2713_v32  ;;  %3960 = vst [vmem:[#allocation52_spill] sm:$0xff] %v2734_v1  ;;  %v556_v31 = vmax.f32 %v2713_v32, %v2718_v41  ;;  %v263_v32 = vld [vmem:[%s2282_s6 + $0x308] sm:$0xff] }
  0xd2   : > { %545 = vmax.xlane.f32.xlu1 %v544_v47  ;;  %542 = vmax.xlane.f32.xlu0 %v541_v52  ;;  %v2724_v47 = vmul.f32 %v2294_v8, %v251_v0  ;;  %v256_v52 = vld [vmem:[%s2282_s6 + $0x2d0] sm:$0xff]  ;;  %3961 = vst [vmem:[#allocation53_spill] sm:$0xff] %v2741_v10 }
  0xd3   : > { %v2731_v54 = vmul.f32 %v2294_v8, %v256_v52  ;;  %v261_v52 = vld [vmem:[%s2282_s6 + $0x2f8] sm:$0xff] }
  0xd4   : > { %3958 = vst [vmem:[#allocation50_spill] sm:$0xff] %v2724_v47  ;;  %v553_v0 = vmax.f32 %v2721_v62, %v2724_v47  ;;  %v2754_v47 = vmul.f32 %v2294_v8, %v261_v52  ;;  %v2761_v62 = vmul.f32 %v2294_v8, %v258_v9  ;;  %v262_v52 = vld [vmem:[%s2282_s6 + $0x300] sm:$0xff] }
  0xd5   : > { %3959 = vst [vmem:[#allocation51_spill] sm:$0xff] %v2731_v54  ;;  %v562_v28 = vmax.f32 %v2731_v54, %v2734_v1  ;;  %v271_v54 = vld [vmem:[%s2282_s6 + $0x348] sm:$0xff] }
  0xd6   : > { %551 = vmax.xlane.f32.xlu1 %v550_v23  ;;  %548 = vmax.xlane.f32.xlu0 %v547_v63  ;;  %v2744_v23 = vmul.f32 %v2294_v8, %v255_v51  ;;  %v260_v63 = vld [vmem:[%s2282_s6 + $0x2f0] sm:$0xff]  ;;  %3964 = vst [vmem:[#allocation56_spill] sm:$0xff] %v2754_v47  ;;  %3965 = vst [vmem:[#allocation57_spill] sm:$0xff] %v2761_v62 }
  0xd7   : > { %v2751_v41 = vmul.f32 %v2294_v8, %v260_v63  ;;  %v265_v63 = vld [vmem:[%s2282_s6 + $0x318] sm:$0xff] }
  0xd8   : > { %3962 = vst [vmem:[#allocation54_spill] sm:$0xff] %v2744_v23  ;;  %v559_v51 = vmax.f32 %v2741_v10, %v2744_v23  ;;  %v2781_v10 = vmul.f32 %v2294_v8, %v262_v52 }
  0xd9   : > { %3963 = vst [vmem:[#allocation55_spill] sm:$0xff] %v2751_v41  ;;  %v568_v1 = vmax.f32 %v2751_v41, %v2754_v47  ;;  %v269_v47 = vld [vmem:[%s2282_s6 + $0x338] sm:$0xff]  ;;  %v267_v41 = vld [vmem:[%s2282_s6 + $0x328] sm:$0xff] }
  0xda   : > { %557 = vmax.xlane.f32.xlu1 %v556_v31  ;;  %554 = vmax.xlane.f32.xlu0 %v553_v0  ;;  %v2764_v31 = vmul.f32 %v2294_v8, %v259_v33  ;;  %v264_v0 = vld [vmem:[%s2282_s6 + $0x310] sm:$0xff]  ;;  %v2778_v33 = vmul.f32 %v2294_v8, %v265_v63  ;;  %3969 = vst [vmem:[#allocation61_spill] sm:$0xff] %v2781_v10 }
  0xdb   : > { %v2773_v23 = vmul.f32 %v2294_v8, %v264_v0  ;;  %v266_v0 = vld [vmem:[%s2282_s6 + $0x320] sm:$0xff]  ;;  %v2794_v63 = vmul.f32 %v2294_v8, %v269_v47 }
  0xdc   : > { %3966 = vst [vmem:[#allocation58_spill] sm:$0xff] %v2764_v31  ;;  %v565_v9 = vmax.f32 %v2761_v62, %v2764_v31  ;;  %3968 = vst [vmem:[#allocation60_spill] sm:$0xff] %v2778_v33  ;;  %v2801_v62 = vmul.f32 %v2294_v8, %v266_v0  ;;  %v270_v47 = vld [vmem:[%s2282_s6 + $0x340] sm:$0xff] }
  0xdd   : > { %3967 = vst [vmem:[#allocation59_spill] sm:$0xff] %v2773_v23  ;;  %3972 = vst [vmem:[#allocation64_spill] sm:$0xff] %v2794_v63  ;;  %v574_v52 = vmax.f32 %v2773_v23, %v2778_v33  ;;  %v279_v23 = vld [vmem:[%s2282_s6 + $0x388] sm:$0xff] }
  0xde   : > { %563 = vmax.xlane.f32.xlu1 %v562_v28  ;;  %560 = vmax.xlane.f32.xlu0 %v559_v51  ;;  %v2784_v28 = vmul.f32 %v2294_v8, %v263_v32  ;;  %v268_v51 = vld [vmem:[%s2282_s6 + $0x330] sm:$0xff]  ;;  %3973 = vst [vmem:[#allocation65_spill] sm:$0xff] %v2801_v62 }
  0xdf   : > { %v2791_v31 = vmul.f32 %v2294_v8, %v268_v51  ;;  %v273_v51 = vld [vmem:[%s2282_s6 + $0x358] sm:$0xff] }
  0xe0   : > { %3970 = vst [vmem:[#allocation62_spill] sm:$0xff] %v2784_v28  ;;  %v571_v32 = vmax.f32 %v2781_v10, %v2784_v28  ;;  %v2821_v10 = vmul.f32 %v2294_v8, %v270_v47 }
  0xe1   : > { %3971 = vst [vmem:[#allocation63_spill] sm:$0xff] %v2791_v31  ;;  %v580_v33 = vmax.f32 %v2791_v31, %v2794_v63  ;;  %v277_v63 = vld [vmem:[%s2282_s6 + $0x378] sm:$0xff]  ;;  %v275_v31 = vld [vmem:[%s2282_s6 + $0x368] sm:$0xff] }
  0xe2   : > { %569 = vmax.xlane.f32.xlu1 %v568_v1  ;;  %566 = vmax.xlane.f32.xlu0 %v565_v9  ;;  %v2804_v1 = vmul.f32 %v2294_v8, %v267_v41  ;;  %v272_v9 = vld [vmem:[%s2282_s6 + $0x350] sm:$0xff]  ;;  %v2818_v41 = vmul.f32 %v2294_v8, %v273_v51  ;;  %3977 = vst [vmem:[#allocation69_spill] sm:$0xff] %v2821_v10 }
  0xe3   : > { %v2813_v28 = vmul.f32 %v2294_v8, %v272_v9  ;;  %v274_v9 = vld [vmem:[%s2282_s6 + $0x360] sm:$0xff]  ;;  %v2834_v51 = vmul.f32 %v2294_v8, %v277_v63 }
  0xe4   : > { %3974 = vst [vmem:[#allocation66_spill] sm:$0xff] %v2804_v1  ;;  %v577_v0 = vmax.f32 %v2801_v62, %v2804_v1  ;;  %3976 = vst [vmem:[#allocation68_spill] sm:$0xff] %v2818_v41  ;;  %v2841_v62 = vmul.f32 %v2294_v8, %v274_v9  ;;  %v278_v63 = vld [vmem:[%s2282_s6 + $0x380] sm:$0xff] }
  0xe5   : > { %3975 = vst [vmem:[#allocation67_spill] sm:$0xff] %v2813_v28  ;;  %3980 = vst [vmem:[#allocation72_spill] sm:$0xff] %v2834_v51  ;;  %v586_v47 = vmax.f32 %v2813_v28, %v2818_v41  ;;  %v283_v28 = vld [vmem:[%s2282_s6 + $0x3a8] sm:$0xff] }
  0xe6   : > { %575 = vmax.xlane.f32.xlu1 %v574_v52  ;;  %572 = vmax.xlane.f32.xlu0 %v571_v32  ;;  %v2824_v52 = vmul.f32 %v2294_v8, %v271_v54  ;;  %v276_v32 = vld [vmem:[%s2282_s6 + $0x370] sm:$0xff]  ;;  %3981 = vst [vmem:[#allocation73_spill] sm:$0xff] %v2841_v62 }
  0xe7   : > { %v2831_v1 = vmul.f32 %v2294_v8, %v276_v32  ;;  %v281_v32 = vld [vmem:[%s2282_s6 + $0x398] sm:$0xff] }
  0xe8   : > { %3978 = vst [vmem:[#allocation70_spill] sm:$0xff] %v2824_v52  ;;  %v583_v54 = vmax.f32 %v2821_v10, %v2824_v52  ;;  %v2854_v52 = vmul.f32 %v2294_v8, %v281_v32  ;;  %v2861_v10 = vmul.f32 %v2294_v8, %v278_v63  ;;  %v282_v32 = vld [vmem:[%s2282_s6 + $0x3a0] sm:$0xff] }
  0xe9   : > { %3979 = vst [vmem:[#allocation71_spill] sm:$0xff] %v2831_v1  ;;  %v592_v9 = vmax.f32 %v2831_v1, %v2834_v51 }
  0xea   : > { %581 = vmax.xlane.f32.xlu1 %v580_v33  ;;  %578 = vmax.xlane.f32.xlu0 %v577_v0  ;;  %v2844_v33 = vmul.f32 %v2294_v8, %v275_v31  ;;  %v280_v0 = vld [vmem:[%s2282_s6 + $0x390] sm:$0xff]  ;;  %3984 = vst [vmem:[#allocation76_spill] sm:$0xff] %v2854_v52  ;;  %3985 = vst [vmem:[#allocation77_spill] sm:$0xff] %v2861_v10 }
  0xeb   : > { %v2851_v41 = vmul.f32 %v2294_v8, %v280_v0  ;;  %v285_v0 = vld [vmem:[%s2282_s6 + $0x3b8] sm:$0xff] }
  0xec   : > { %3982 = vst [vmem:[#allocation74_spill] sm:$0xff] %v2844_v33  ;;  %v589_v31 = vmax.f32 %v2841_v62, %v2844_v33  ;;  %v2881_v62 = vmul.f32 %v2294_v8, %v282_v32 }
  0xed   : > { %3983 = vst [vmem:[#allocation75_spill] sm:$0xff] %v2851_v41  ;;  %v598_v51 = vmax.f32 %v2851_v41, %v2854_v52  ;;  %v289_v52 = vld [vmem:[%s2282_s6 + $0x3d8] sm:$0xff]  ;;  %v287_v41 = vld [vmem:[%s2282_s6 + $0x3c8] sm:$0xff] }
  0xee   : > { %587 = vmax.xlane.f32.xlu1 %v586_v47  ;;  %584 = vmax.xlane.f32.xlu0 %v583_v54  ;;  %v2864_v47 = vmul.f32 %v2294_v8, %v279_v23  ;;  %v284_v54 = vld [vmem:[%s2282_s6 + $0x3b0] sm:$0xff]  ;;  %v2878_v23 = vmul.f32 %v2294_v8, %v285_v0  ;;  %3988 = vst [vmem:[#allocation80_spill] sm:$0xff] %v2881_v62 }
  0xef   : > { %v2873_v33 = vmul.f32 %v2294_v8, %v284_v54  ;;  %v286_v54 = vld [vmem:[%s2282_s6 + $0x3c0] sm:$0xff]  ;;  %v2894_v0 = vmul.f32 %v2294_v8, %v289_v52  ;;  %v2904_v1 = vmul.f32 %v2294_v8, %v287_v41  ;;  %v2921_v41 = vmul.f32 %v2294_v8, %v290_v45 }
  0xf0   : > { %3986 = vst [vmem:[#allocation78_spill] sm:$0xff] %v2864_v47  ;;  %v595_v63 = vmax.f32 %v2861_v10, %v2864_v47  ;;  %3987 = vst [vmem:[#allocation79_spill] sm:$0xff] %v2878_v23  ;;  %v2901_v10 = vmul.f32 %v2294_v8, %v286_v54 }
  0xf1   : > { %3990 = vst [vmem:[#allocation82_spill] sm:$0xff] %v2894_v0  ;;  %v604_v32 = vmax.f32 %v2873_v33, %v2878_v23  ;;  %3992 = vst [vmem:[#allocation84_spill] sm:$0xff] %v2904_v1 }
  0xf2   : > { %593 = vmax.xlane.f32.xlu1 %v592_v9  ;;  %590 = vmax.xlane.f32.xlu0 %v589_v31  ;;  %v2884_v9 = vmul.f32 %v2294_v8, %v283_v28  ;;  %v288_v31 = vld [vmem:[%s2282_s6 + $0x3d0] sm:$0xff]  ;;  %3991 = vst [vmem:[#allocation83_spill] sm:$0xff] %v2901_v10 }
  0xf3   : > { %v2891_v47 = vmul.f32 %v2294_v8, %v288_v31  ;;  %v291_v31 = vld [vmem:[%s2282_s6 + $0x3e8] sm:$0xff] }
  0xf4   : > { %3989 = vst [vmem:[#allocation81_spill] sm:$0xff] %v2884_v9  ;;  %v601_v28 = vmax.f32 %v2881_v62, %v2884_v9  ;;  %v607_v9 = vmax.f32 %v2901_v10, %v2904_v1  ;;  %v2924_v62 = vmul.f32 %v2294_v8, %v291_v31 }
  0xf5   : > { %v610_v52 = vmax.f32 %v2891_v47, %v2894_v0 }
  0xf6   : > { %599 = vmax.xlane.f32.xlu1 %v598_v51  ;;  %596 = vmax.xlane.f32.xlu0 %v595_v63  ;;  %v292_v51 = vld [vmem:[%s2282_s6 + $0x3f0] sm:$0xff]  ;;  %v293_v63 = vld [vmem:[%s2282_s6 + $0x3f8] sm:$0xff]  ;;  %3995 = vst [vmem:[#allocation87_spill] sm:$0xff] %v2924_v62 }
  0xf7   : > { %v2913_v23 = vmul.f32 %v2294_v8, %v292_v51  ;;  %v2918_v54 = vmul.f32 %v2294_v8, %v293_v63 }
  0xf9   : > { %3993 = vst [vmem:[#allocation85_spill] sm:$0xff] %v2913_v23  ;;  %3994 = vst [vmem:[#allocation86_spill] sm:$0xff] %v2918_v54 }
  0xfa   : > { %605 = vmax.xlane.f32.xlu1 %v604_v32  ;;  %602 = vmax.xlane.f32.xlu0 %v601_v28  ;;  %v616_v32 = vmax.f32 %v2913_v23, %v2918_v54  ;;  %v613_v28 = vmax.f32 %v2921_v41, %v2924_v62 }
  0xfe   : > { %611 = vmax.xlane.f32.xlu1 %v610_v52  ;;  %608 = vmax.xlane.f32.xlu0 %v607_v9 }
 0x102   : > { %617 = vmax.xlane.f32.xlu1 %v616_v32  ;;  %614 = vmax.xlane.f32.xlu0 %v613_v28 }
 0x10f   : > { %v435_v51 = vpop.xlane.xlu1 %434  ;;  %v429_v1 = vpop.xlane.xlu0 %428 }
 0x110   : > { %v623_v63 = vsub.f32 %v2299_v11, %v435_v51  ;;  %v624_v45 = vsub.f32 %v2302_v12, %v435_v51  ;;  %v619_v0 = vsub.f32 %v2305_v13, %v429_v1  ;;  %v620_v8 = vsub.f32 %v2308_v14, %v429_v1 }
 0x112   : > { %v755_v31 = vmul.f32 1.442695, %v623_v63  ;;  %v757_v9 = vmul.f32 1.442695, %v624_v45  ;;  %v747_v52 = vmul.f32 1.442695, %v619_v0 }
 0x113   : > { %v749_v10 = vmul.f32 1.442695, %v620_v8  ;;  %v438_v54 = vpop.xlane.xlu1 %437  ;;  %v432_v23 = vpop.xlane.xlu0 %431 }
 0x114   : > { %1677 = vpow2.f32 %v755_v31  ;;  %v625_v32 = vsub.f32 %v2311_v15, %v438_v54  ;;  %v626_v28 = vsub.f32 %v2314_v16, %v438_v54  ;;  %v621_v62 = vsub.f32 %v2321_v19, %v432_v23 }
 0x115   : > { %1679 = vpow2.f32 %v757_v9  ;;  %v622_v11 = vsub.f32 %v2324_v20, %v432_v23 }
 0x116   : > { %1681 = vpow2.f32 %v747_v52  ;;  %v759_v12 = vmul.f32 1.442695, %v625_v32  ;;  %v761_v13 = vmul.f32 1.442695, %v626_v28  ;;  %v751_v14 = vmul.f32 1.442695, %v621_v62 }
 0x117   : > { %1683 = vpow2.f32 %v749_v10  ;;  %v753_v1 = vmul.f32 1.442695, %v622_v11  ;;  %v444_v0 = vpop.xlane.xlu1 %443  ;;  %v441_v51 = vpop.xlane.xlu0 %440 }
 0x118   : > { %1685 = vpow2.f32 %v759_v12  ;;  %v629_v63 = vsub.f32 %v2331_v25, %v444_v0  ;;  %v630_v15 = vsub.f32 %v2334_v26, %v444_v0  ;;  %v627_v16 = vsub.f32 %v2341_v29, %v441_v51 }
 0x119   : > { %1687 = vpow2.f32 %v761_v13  ;;  %v628_v19 = vsub.f32 %v2344_v30, %v441_v51 }
 0x11a   : > { %1689 = vpow2.f32 %v751_v14  ;;  %v767_v20 = vmul.f32 1.442695, %v629_v63  ;;  %v769_v23 = vmul.f32 1.442695, %v630_v15  ;;  %v763_v54 = vmul.f32 1.442695, %v627_v16 }
 0x11b   : > { %1691 = vpow2.f32 %v753_v1  ;;  %v765_v62 = vmul.f32 1.442695, %v628_v19  ;;  %v450_v10 = vpop.xlane.xlu1 %449  ;;  %v447_v45 = vpop.xlane.xlu0 %446 }
 0x11c   : > { %1693 = vpow2.f32 %v767_v20  ;;  %v633_v8 = vsub.f32 %v2351_v35, %v450_v10  ;;  %v634_v25 = vsub.f32 %v2354_v36, %v450_v10  ;;  %v631_v26 = vsub.f32 %v2361_v39, %v447_v45 }
 0x11d   : > { %1695 = vpow2.f32 %v769_v23  ;;  %v632_v29 = vsub.f32 %v2364_v40, %v447_v45 }
 0x11e   : > { %1697 = vpow2.f32 %v763_v54  ;;  %v775_v30 = vmul.f32 1.442695, %v633_v8  ;;  %v777_v31 = vmul.f32 1.442695, %v634_v25  ;;  %v771_v9 = vmul.f32 1.442695, %v631_v26 }
 0x11f   : > { %1699 = vpow2.f32 %v765_v62  ;;  %v773_v52 = vmul.f32 1.442695, %v632_v29  ;;  %v456_v32 = vpop.xlane.xlu1 %455  ;;  %v453_v28 = vpop.xlane.xlu0 %452 }
 0x120   : > { %1701 = vpow2.f32 %v775_v30  ;;  %v637_v11 = vsub.f32 %v2373_v46, %v456_v32  ;;  %v638_v35 = vsub.f32 %v2378_v48, %v456_v32  ;;  %v635_v36 = vsub.f32 %v2381_v49, %v453_v28 }
 0x121   : > { %v2949_v12 = vpop.eup %1677  ;;  %1703 = vpow2.f32 %v777_v31  ;;  %v636_v39 = vsub.f32 %v2384_v50, %v453_v28 }
 0x122   : > { %v2952_v40 = vpop.eup %1679  ;;  %1705 = vpow2.f32 %v771_v9  ;;  %v783_v13 = vmul.f32 1.442695, %v637_v11  ;;  %v785_v14 = vmul.f32 1.442695, %v638_v35  ;;  %v779_v1 = vmul.f32 1.442695, %v635_v36 }
 0x123   : > { %v2954_v0 = vpop.eup %1681  ;;  %1707 = vpow2.f32 %v773_v52  ;;  %v781_v51 = vmul.f32 1.442695, %v636_v39  ;;  %v462_v46 = vpop.xlane.xlu1 %461  ;;  %v1009_v31 = vadd.f32 %v2952_v40, %v2949_v12 }
 0x124   : > { %v459_v63 = vpop.xlane.xlu0 %458  ;;  %v2956_v48 = vpop.eup %1683  ;;  %1709 = vpow2.f32 %v783_v13  ;;  %v641_v49 = vsub.f32 %v2391_v55, %v462_v46  ;;  %v642_v15 = vsub.f32 %v2394_v56, %v462_v46 }
 0x125   : > { %v639_v50 = vsub.f32 %v2401_v59, %v459_v63  ;;  %v2961_v16 = vpop.eup %1685  ;;  %1711 = vpow2.f32 %v785_v14  ;;  %v640_v19 = vsub.f32 %v2404_v60, %v459_v63  ;;  %v1003_v20 = vadd.f32 %v2956_v48, %v2954_v0 }
 0x126   : > { %v2966_v23 = vpop.eup %1687  ;;  %1713 = vpow2.f32 %v779_v1  ;;  %v791_v54 = vmul.f32 1.442695, %v641_v49  ;;  %v793_v62 = vmul.f32 1.442695, %v642_v15 }
 0x127   : > { %v787_v10 = vmul.f32 1.442695, %v639_v50  ;;  %v2968_v45 = vpop.eup %1689  ;;  %1715 = vpow2.f32 %v781_v51  ;;  %v789_v55 = vmul.f32 1.442695, %v640_v19  ;;  %1004 = vadd.xlane.f32.xlu0 %v1003_v20  ;;  %v468_v56 = vpop.xlane.xlu1 %467  ;;  %v1012_v51 = vadd.f32 %v2966_v23, %v2961_v16 }
 0x128   : > { %v465_v59 = vpop.xlane.xlu0 %464  ;;  %v2970_v8 = vpop.eup %1691  ;;  %1717 = vpow2.f32 %v791_v54  ;;  %v645_v60 = vsub.f32 %v2413_v2, %v468_v56  ;;  %v646_v25 = vsub.f32 %v2418_v4, %v468_v56 }
 0x129   : > { %v643_v26 = vsub.f32 %v2421_v5, %v465_v59  ;;  %v2975_v29 = vpop.eup %1693  ;;  %1719 = vpow2.f32 %v793_v62  ;;  %v644_v30 = vsub.f32 %v2424_v6, %v465_v59  ;;  %v1006_v9 = vadd.f32 %v2970_v8, %v2968_v45 }
 0x12a   : > { %v2982_v52 = vpop.eup %1695  ;;  %1721 = vpow2.f32 %v787_v10  ;;  %v799_v32 = vmul.f32 1.442695, %v645_v60  ;;  %v801_v2 = vmul.f32 1.442695, %v646_v25 }
 0x12b   : > { %v795_v28 = vmul.f32 1.442695, %v643_v26  ;;  %v2984_v4 = vpop.eup %1697  ;;  %1723 = vpow2.f32 %v789_v55  ;;  %v797_v5 = vmul.f32 1.442695, %v644_v30  ;;  %1010 = vadd.xlane.f32.xlu0 %v1009_v31  ;;  %1007 = vadd.xlane.f32.xlu1 %v1006_v9  ;;  %v474_v11 = vpop.xlane.xlu1 %473  ;;  %v1018_v56 = vadd.f32 %v2982_v52, %v2975_v29 }
 0x12c   : > { %v471_v6 = vpop.xlane.xlu0 %470  ;;  %v2986_v35 = vpop.eup %1699  ;;  %1725 = vpow2.f32 %v799_v32  ;;  %v649_v36 = vsub.f32 %v2431_v18, %v474_v11  ;;  %v650_v39 = vsub.f32 %v2434_v21, %v474_v11 }
 0x12d   : > { %v647_v13 = vsub.f32 %v2441_v24, %v471_v6  ;;  %v2991_v14 = vpop.eup %1701  ;;  %1727 = vpow2.f32 %v801_v2  ;;  %v648_v1 = vsub.f32 %v2444_v27, %v471_v6  ;;  %v1015_v46 = vadd.f32 %v2986_v35, %v2984_v4 }
 0x12e   : > { %v2998_v63 = vpop.eup %1703  ;;  %1729 = vpow2.f32 %v795_v28  ;;  %v807_v49 = vmul.f32 1.442695, %v649_v36  ;;  %v809_v18 = vmul.f32 1.442695, %v650_v39 }
 0x12f   : > { %v803_v15 = vmul.f32 1.442695, %v647_v13  ;;  %v3000_v21 = vpop.eup %1705  ;;  %1731 = vpow2.f32 %v797_v5  ;;  %v805_v24 = vmul.f32 1.442695, %v648_v1  ;;  %1013 = vadd.xlane.f32.xlu1 %v1012_v51  ;;  %1016 = vadd.xlane.f32.xlu0 %v1015_v46  ;;  %v480_v50 = vpop.xlane.xlu1 %479  ;;  %v1024_v11 = vadd.f32 %v2998_v63, %v2991_v14 }
 0x130   : > { %v477_v27 = vpop.xlane.xlu0 %476  ;;  %v3002_v19 = vpop.eup %1707  ;;  %1733 = vpow2.f32 %v807_v49  ;;  %v653_v20 = vsub.f32 %v2451_v34, %v480_v50  ;;  %v654_v54 = vsub.f32 %v2454_v37, %v480_v50 }
 0x131   : > { %v651_v62 = vsub.f32 %v2461_v42, %v477_v27  ;;  %v3007_v10 = vpop.eup %1709  ;;  %1735 = vpow2.f32 %v809_v18  ;;  %v652_v55 = vsub.f32 %v2464_v43, %v477_v27  ;;  %v1021_v59 = vadd.f32 %v3002_v19, %v3000_v21 }
 0x132   : > { %v3014_v60 = vpop.eup %1711  ;;  %1737 = vpow2.f32 %v803_v15  ;;  %v815_v25 = vmul.f32 1.442695, %v653_v20  ;;  %v817_v34 = vmul.f32 1.442695, %v654_v54 }
 0x133   : > { %v811_v26 = vmul.f32 1.442695, %v651_v62  ;;  %v3016_v37 = vpop.eup %1713  ;;  %1739 = vpow2.f32 %v805_v24  ;;  %v813_v42 = vmul.f32 1.442695, %v652_v55  ;;  %1019 = vadd.xlane.f32.xlu1 %v1018_v56  ;;  %1022 = vadd.xlane.f32.xlu0 %v1021_v59  ;;  %v486_v30 = vpop.xlane.xlu1 %485  ;;  %v1030_v50 = vadd.f32 %v3014_v60, %v3007_v10 }
 0x134   : > { %v483_v43 = vpop.xlane.xlu0 %482  ;;  %v3018_v31 = vpop.eup %1715  ;;  %1741 = vpow2.f32 %v815_v25  ;;  %v657_v9 = vsub.f32 %v2473_v53, %v486_v30  ;;  %v658_v32 = vsub.f32 %v2478_v57, %v486_v30  ;;  %v3997_v30 = vld [vmem:[#allocation10_spill] sm:$0xff] }
 0x135   : > { %v655_v2 = vsub.f32 %v2481_v58, %v483_v43  ;;  %v3023_v28 = vpop.eup %1717  ;;  %1743 = vpow2.f32 %v817_v34  ;;  %v656_v5 = vsub.f32 %v2484_v61, %v483_v43  ;;  %v1027_v6 = vadd.f32 %v3018_v31, %v3016_v37  ;;  %v3996_v34 = vld [vmem:[#allocation9_spill] sm:$0xff] }
 0x136   : > { %v3030_v36 = vpop.eup %1719  ;;  %1745 = vpow2.f32 %v811_v26  ;;  %v823_v39 = vmul.f32 1.442695, %v657_v9  ;;  %v825_v53 = vmul.f32 1.442695, %v658_v32 }
 0x137   : > { %v819_v13 = vmul.f32 1.442695, %v655_v2  ;;  %v3032_v57 = vpop.eup %1721  ;;  %1747 = vpow2.f32 %v813_v42  ;;  %v821_v58 = vmul.f32 1.442695, %v656_v5  ;;  %1025 = vadd.xlane.f32.xlu1 %v1024_v11  ;;  %1028 = vadd.xlane.f32.xlu0 %v1027_v6  ;;  %v492_v1 = vpop.xlane.xlu1 %491  ;;  %v1036_v9 = vadd.f32 %v3030_v36, %v3023_v28 }
 0x138   : > { %v489_v61 = vpop.xlane.xlu0 %488  ;;  %v3034_v51 = vpop.eup %1723  ;;  %1749 = vpow2.f32 %v823_v39  ;;  %v661_v46 = vsub.f32 %v2491_v3, %v492_v1  ;;  %v662_v49 = vsub.f32 %v2494_v7, %v492_v1 }
 0x139   : > { %v659_v18 = vsub.f32 %v2501_v17, %v489_v61  ;;  %v3039_v15 = vpop.eup %1725  ;;  %1751 = vpow2.f32 %v825_v53  ;;  %v660_v24 = vsub.f32 %v2504_v22, %v489_v61  ;;  %v1033_v27 = vadd.f32 %v3034_v51, %v3032_v57  ;;  %v3999_v61 = vld [vmem:[#allocation12_spill] sm:$0xff] }
 0x13a   : > { %v3046_v20 = vpop.eup %1727  ;;  %1753 = vpow2.f32 %v819_v13  ;;  %v831_v54 = vmul.f32 1.442695, %v661_v46  ;;  %v833_v3 = vmul.f32 1.442695, %v662_v49  ;;  %v4000_v49 = vld [vmem:[#allocation13_spill] sm:$0xff] }
 0x13b   : > { %v827_v62 = vmul.f32 1.442695, %v659_v18  ;;  %v3048_v7 = vpop.eup %1729  ;;  %1755 = vpow2.f32 %v821_v58  ;;  %v829_v17 = vmul.f32 1.442695, %v660_v24  ;;  %1031 = vadd.xlane.f32.xlu1 %v1030_v50  ;;  %1034 = vadd.xlane.f32.xlu0 %v1033_v27  ;;  %v498_v55 = vpop.xlane.xlu1 %497  ;;  %v3998_v58 = vld [vmem:[#allocation11_spill] sm:$0xff]  ;;  %v4001_v50 = vld [vmem:[#allocation14_spill] sm:$0xff] }
 0x13c   : > { %v495_v22 = vpop.xlane.xlu0 %494  ;;  %v3050_v56 = vpop.eup %1731  ;;  %1757 = vpow2.f32 %v831_v54  ;;  %v665_v59 = vsub.f32 %v2513_v38, %v498_v55  ;;  %v666_v25 = vsub.f32 %v2518_v44, %v498_v55  ;;  %v1042_v54 = vadd.f32 %v3046_v20, %v3039_v15 }
 0x13d   : > { %v663_v26 = vsub.f32 %v3996_v34, %v495_v22  ;;  %v3055_v42 = vpop.eup %1733  ;;  %1759 = vpow2.f32 %v833_v3  ;;  %v664_v43 = vsub.f32 %v3997_v30, %v495_v22  ;;  %v1039_v32 = vadd.f32 %v3050_v56, %v3048_v7 }
 0x13e   : > { %v3062_v2 = vpop.eup %1735  ;;  %1761 = vpow2.f32 %v827_v62  ;;  %v839_v5 = vmul.f32 1.442695, %v665_v59  ;;  %v841_v38 = vmul.f32 1.442695, %v666_v25 }
 0x13f   : > { %v835_v11 = vmul.f32 1.442695, %v663_v26  ;;  %v3064_v44 = vpop.eup %1737  ;;  %1763 = vpow2.f32 %v829_v17  ;;  %v837_v6 = vmul.f32 1.442695, %v664_v43  ;;  %1037 = vadd.xlane.f32.xlu1 %v1036_v9  ;;  %1040 = vadd.xlane.f32.xlu0 %v1039_v32  ;;  %v504_v39 = vpop.xlane.xlu1 %503  ;;  %v4002_v43 = vld [vmem:[#allocation15_spill] sm:$0xff]  ;;  %v4003_v32 = vld [vmem:[#allocation16_spill] sm:$0xff] }
 0x140   : > { %v501_v53 = vpop.xlane.xlu0 %500  ;;  %v3066_v13 = vpop.eup %1739  ;;  %1765 = vpow2.f32 %v839_v5  ;;  %v669_v1 = vsub.f32 %v3998_v58, %v504_v39  ;;  %v670_v46 = vsub.f32 %v3999_v61, %v504_v39 }
 0x141   : > { %v667_v18 = vsub.f32 %v4000_v49, %v501_v53  ;;  %v3071_v24 = vpop.eup %1741  ;;  %1767 = vpow2.f32 %v841_v38  ;;  %v668_v27 = vsub.f32 %v4001_v50, %v501_v53  ;;  %v1045_v3 = vadd.f32 %v3066_v13, %v3064_v44  ;;  %v4004_v38 = vld [vmem:[#allocation17_spill] sm:$0xff]  ;;  %v4006_v53 = vld [vmem:[#allocation18_spill] sm:$0xff] }
 0x142   : > { %v3078_v62 = vpop.eup %1743  ;;  %1769 = vpow2.f32 %v835_v11  ;;  %v847_v17 = vmul.f32 1.442695, %v669_v1  ;;  %v849_v55 = vmul.f32 1.442695, %v670_v46 }
 0x143   : > { %v843_v22 = vmul.f32 1.442695, %v667_v18  ;;  %v3080_v59 = vpop.eup %1745  ;;  %1771 = vpow2.f32 %v837_v6  ;;  %v845_v25 = vmul.f32 1.442695, %v668_v27  ;;  %1043 = vadd.xlane.f32.xlu1 %v1042_v54  ;;  %1046 = vadd.xlane.f32.xlu0 %v1045_v3  ;;  %v510_v34 = vpop.xlane.xlu1 %509  ;;  %v1048_v6 = vadd.f32 %v3062_v2, %v3055_v42 }
 0x144   : > { %v507_v26 = vpop.xlane.xlu0 %506  ;;  %v3082_v30 = vpop.eup %1747  ;;  %1773 = vpow2.f32 %v847_v17  ;;  %v673_v9 = vsub.f32 %v4002_v43, %v510_v34  ;;  %v674_v5 = vsub.f32 %v4003_v32, %v510_v34  ;;  %v4012_v32 = vld [vmem:[#allocation21_spill] sm:$0xff] }
 0x145   : > { %v671_v11 = vsub.f32 %v4004_v38, %v507_v26  ;;  %v3087_v39 = vpop.eup %1749  ;;  %1775 = vpow2.f32 %v849_v55  ;;  %v672_v58 = vsub.f32 %v4006_v53, %v507_v26  ;;  %v1051_v1 = vadd.f32 %v3082_v30, %v3080_v59  ;;  %v4010_v55 = vld [vmem:[#allocation19_spill] sm:$0xff]  ;;  %v4011_v26 = vld [vmem:[#allocation20_spill] sm:$0xff] }
 0x146   : > { %4005 = vst [vmem:[#allocation9_spill] sm:$0xff] %v3087_v39  ;;  %v3094_v61 = vpop.eup %1751  ;;  %1777 = vpow2.f32 %v843_v22  ;;  %v855_v46 = vmul.f32 1.442695, %v673_v9  ;;  %v857_v49 = vmul.f32 1.442695, %v674_v5  ;;  %v4014_v5 = vld [vmem:[#allocation22_spill] sm:$0xff] }
 0x147   : > { %4007 = vst [vmem:[#allocation10_spill] sm:$0xff] %v3094_v61  ;;  %v851_v18 = vmul.f32 1.442695, %v671_v11  ;;  %v3096_v50 = vpop.eup %1753  ;;  %1779 = vpow2.f32 %v845_v25  ;;  %v853_v27 = vmul.f32 1.442695, %v672_v58  ;;  %1049 = vadd.xlane.f32.xlu1 %v1048_v6  ;;  %1052 = vadd.xlane.f32.xlu0 %v1051_v1  ;;  %v516_v54 = vpop.xlane.xlu1 %515  ;;  %v1054_v25 = vadd.f32 %v3078_v62, %v3071_v24 }
 0x148   : > { %4008 = vst [vmem:[#allocation11_spill] sm:$0xff] %v3096_v50  ;;  %v513_v3 = vpop.xlane.xlu0 %512  ;;  %v3098_v17 = vpop.eup %1755  ;;  %1781 = vpow2.f32 %v855_v46  ;;  %v677_v34 = vsub.f32 %v4010_v55, %v516_v54  ;;  %v678_v43 = vsub.f32 %v4011_v26, %v516_v54  ;;  %v4018_v26 = vld [vmem:[#allocation23_spill] sm:$0xff] }
 0x149   : > { %4009 = vst [vmem:[#allocation12_spill] sm:$0xff] %v3098_v17  ;;  %v675_v22 = vsub.f32 %v4012_v32, %v513_v3  ;;  %v3103_v9 = vpop.eup %1757  ;;  %1783 = vpow2.f32 %v857_v49  ;;  %v676_v38 = vsub.f32 %v4014_v5, %v513_v3  ;;  %v1057_v11 = vadd.f32 %v3098_v17, %v3096_v50  ;;  %v4019_v5 = vld [vmem:[#allocation24_spill] sm:$0xff]  ;;  %v4020_v50 = vld [vmem:[#allocation25_spill] sm:$0xff] }
 0x14a   : > { %4013 = vst [vmem:[#allocation13_spill] sm:$0xff] %v3103_v9  ;;  %v3110_v53 = vpop.eup %1759  ;;  %1785 = vpow2.f32 %v851_v18  ;;  %v863_v58 = vmul.f32 1.442695, %v677_v34  ;;  %v865_v6 = vmul.f32 1.442695, %v678_v43  ;;  %v4022_v43 = vld [vmem:[#allocation26_spill] sm:$0xff] }
 0x14b   : > { %4015 = vst [vmem:[#allocation14_spill] sm:$0xff] %v3110_v53  ;;  %v859_v1 = vmul.f32 1.442695, %v675_v22  ;;  %v3112_v46 = vpop.eup %1761  ;;  %1787 = vpow2.f32 %v853_v27  ;;  %v861_v54 = vmul.f32 1.442695, %v676_v38  ;;  %1055 = vadd.xlane.f32.xlu1 %v1054_v25  ;;  %1058 = vadd.xlane.f32.xlu0 %v1057_v11  ;;  %v522_v49 = vpop.xlane.xlu1 %521  ;;  %v1060_v27 = vadd.f32 %v3094_v61, %v3087_v39  ;;  %v4028_v39 = vld [vmem:[#allocation29_spill] sm:$0xff] }
 0x14c   : > { %4016 = vst [vmem:[#allocation15_spill] sm:$0xff] %v3112_v46  ;;  %v519_v3 = vpop.xlane.xlu0 %518  ;;  %v3114_v55 = vpop.eup %1763  ;;  %1789 = vpow2.f32 %v863_v58  ;;  %v681_v32 = vsub.f32 %v4018_v26, %v522_v49  ;;  %v682_v17 = vsub.f32 %v4019_v5, %v522_v49 }
 0x14d   : > { %4017 = vst [vmem:[#allocation16_spill] sm:$0xff] %v3114_v55  ;;  %v679_v18 = vsub.f32 %v4020_v50, %v519_v3  ;;  %v3119_v34 = vpop.eup %1765  ;;  %1791 = vpow2.f32 %v865_v6  ;;  %v680_v22 = vsub.f32 %v4022_v43, %v519_v3  ;;  %v1063_v38 = vadd.f32 %v3114_v55, %v3112_v46  ;;  %v4026_v43 = vld [vmem:[#allocation27_spill] sm:$0xff]  ;;  %v4027_v55 = vld [vmem:[#allocation28_spill] sm:$0xff] }
 0x14e   : > { %4021 = vst [vmem:[#allocation17_spill] sm:$0xff] %v3119_v34  ;;  %v3126_v25 = vpop.eup %1767  ;;  %1793 = vpow2.f32 %v859_v1  ;;  %v871_v11 = vmul.f32 1.442695, %v681_v32  ;;  %v873_v58 = vmul.f32 1.442695, %v682_v17  ;;  %v4030_v17 = vld [vmem:[#allocation30_spill] sm:$0xff] }
 0x14f   : > { %4023 = vst [vmem:[#allocation18_spill] sm:$0xff] %v3126_v25  ;;  %v867_v26 = vmul.f32 1.442695, %v679_v18  ;;  %v3128_v49 = vpop.eup %1769  ;;  %1795 = vpow2.f32 %v861_v54  ;;  %v869_v50 = vmul.f32 1.442695, %v680_v22  ;;  %1061 = vadd.xlane.f32.xlu1 %v1060_v27  ;;  %1064 = vadd.xlane.f32.xlu0 %v1063_v38  ;;  %v528_v6 = vpop.xlane.xlu1 %527  ;;  %v1066_v54 = vadd.f32 %v3110_v53, %v3103_v9  ;;  %v4036_v9 = vld [vmem:[#allocation33_spill] sm:$0xff] }
 0x150   : > { %4024 = vst [vmem:[#allocation19_spill] sm:$0xff] %v3128_v49  ;;  %v525_v3 = vpop.xlane.xlu0 %524  ;;  %v3130_v5 = vpop.eup %1771  ;;  %1797 = vpow2.f32 %v871_v11  ;;  %v685_v61 = vsub.f32 %v4026_v43, %v528_v6  ;;  %v686_v46 = vsub.f32 %v4027_v55, %v528_v6 }
 0x151   : > { %4025 = vst [vmem:[#allocation20_spill] sm:$0xff] %v3130_v5  ;;  %v683_v1 = vsub.f32 %v4028_v39, %v525_v3  ;;  %v3135_v32 = vpop.eup %1773  ;;  %1799 = vpow2.f32 %v873_v58  ;;  %v684_v18 = vsub.f32 %v4030_v17, %v525_v3  ;;  %v1069_v22 = vadd.f32 %v3130_v5, %v3128_v49  ;;  %v4034_v17 = vld [vmem:[#allocation31_spill] sm:$0xff]  ;;  %v4035_v5 = vld [vmem:[#allocation32_spill] sm:$0xff] }
 0x152   : > { %4029 = vst [vmem:[#allocation21_spill] sm:$0xff] %v3135_v32  ;;  %v3142_v27 = vpop.eup %1775  ;;  %1801 = vpow2.f32 %v867_v26  ;;  %v879_v38 = vmul.f32 1.442695, %v685_v61  ;;  %v881_v11 = vmul.f32 1.442695, %v686_v46  ;;  %v4038_v46 = vld [vmem:[#allocation34_spill] sm:$0xff] }
 0x153   : > { %4031 = vst [vmem:[#allocation22_spill] sm:$0xff] %v3142_v27  ;;  %v875_v43 = vmul.f32 1.442695, %v683_v1  ;;  %v3144_v55 = vpop.eup %1777  ;;  %1803 = vpow2.f32 %v869_v50  ;;  %v877_v39 = vmul.f32 1.442695, %v684_v18  ;;  %1067 = vadd.xlane.f32.xlu1 %v1066_v54  ;;  %1070 = vadd.xlane.f32.xlu0 %v1069_v22  ;;  %v534_v58 = vpop.xlane.xlu1 %533  ;;  %v1072_v50 = vadd.f32 %v3126_v25, %v3119_v34  ;;  %v4044_v34 = vld [vmem:[#allocation37_spill] sm:$0xff] }
 0x154   : > { %4032 = vst [vmem:[#allocation23_spill] sm:$0xff] %v3144_v55  ;;  %v531_v6 = vpop.xlane.xlu0 %530  ;;  %v3146_v3 = vpop.eup %1779  ;;  %1805 = vpow2.f32 %v879_v38  ;;  %v689_v53 = vsub.f32 %v4034_v17, %v534_v58  ;;  %v690_v49 = vsub.f32 %v4035_v5, %v534_v58 }
 0x155   : > { %4033 = vst [vmem:[#allocation24_spill] sm:$0xff] %v3146_v3  ;;  %v687_v26 = vsub.f32 %v4036_v9, %v531_v6  ;;  %v3151_v61 = vpop.eup %1781  ;;  %1807 = vpow2.f32 %v881_v11  ;;  %v688_v1 = vsub.f32 %v4038_v46, %v531_v6  ;;  %v1075_v18 = vadd.f32 %v3146_v3, %v3144_v55  ;;  %v4042_v46 = vld [vmem:[#allocation35_spill] sm:$0xff]  ;;  %v4043_v3 = vld [vmem:[#allocation36_spill] sm:$0xff] }
 0x156   : > { %4037 = vst [vmem:[#allocation25_spill] sm:$0xff] %v3151_v61  ;;  %v3158_v54 = vpop.eup %1783  ;;  %1809 = vpow2.f32 %v875_v43  ;;  %v887_v22 = vmul.f32 1.442695, %v689_v53  ;;  %v889_v38 = vmul.f32 1.442695, %v690_v49  ;;  %v4046_v49 = vld [vmem:[#allocation38_spill] sm:$0xff] }
 0x157   : > { %4039 = vst [vmem:[#allocation26_spill] sm:$0xff] %v3158_v54  ;;  %v883_v17 = vmul.f32 1.442695, %v687_v26  ;;  %v3160_v5 = vpop.eup %1785  ;;  %1811 = vpow2.f32 %v877_v39  ;;  %v885_v9 = vmul.f32 1.442695, %v688_v1  ;;  %1073 = vadd.xlane.f32.xlu1 %v1072_v50  ;;  %1076 = vadd.xlane.f32.xlu0 %v1075_v18  ;;  %v540_v11 = vpop.xlane.xlu1 %539  ;;  %v1078_v39 = vadd.f32 %v3142_v27, %v3135_v32  ;;  %v4052_v32 = vld [vmem:[#allocation41_spill] sm:$0xff] }
 0x158   : > { %4040 = vst [vmem:[#allocation27_spill] sm:$0xff] %v3160_v5  ;;  %v537_v58 = vpop.xlane.xlu0 %536  ;;  %v3162_v6 = vpop.eup %1787  ;;  %1813 = vpow2.f32 %v887_v22  ;;  %v693_v25 = vsub.f32 %v4042_v46, %v540_v11  ;;  %v694_v55 = vsub.f32 %v4043_v3, %v540_v11 }
 0x159   : > { %4041 = vst [vmem:[#allocation28_spill] sm:$0xff] %v3162_v6  ;;  %v691_v43 = vsub.f32 %v4044_v34, %v537_v58  ;;  %v3167_v53 = vpop.eup %1789  ;;  %1815 = vpow2.f32 %v889_v38  ;;  %v692_v26 = vsub.f32 %v4046_v49, %v537_v58  ;;  %v1081_v1 = vadd.f32 %v3162_v6, %v3160_v5  ;;  %v4050_v49 = vld [vmem:[#allocation39_spill] sm:$0xff]  ;;  %v4051_v6 = vld [vmem:[#allocation40_spill] sm:$0xff] }
 0x15a   : > { %4045 = vst [vmem:[#allocation29_spill] sm:$0xff] %v3167_v53  ;;  %v3174_v50 = vpop.eup %1791  ;;  %1817 = vpow2.f32 %v883_v17  ;;  %v895_v18 = vmul.f32 1.442695, %v693_v25  ;;  %v897_v22 = vmul.f32 1.442695, %v694_v55  ;;  %v4054_v55 = vld [vmem:[#allocation42_spill] sm:$0xff] }
 0x15b   : > { %4047 = vst [vmem:[#allocation30_spill] sm:$0xff] %v3174_v50  ;;  %v891_v46 = vmul.f32 1.442695, %v691_v43  ;;  %v3176_v3 = vpop.eup %1793  ;;  %1819 = vpow2.f32 %v885_v9  ;;  %v893_v34 = vmul.f32 1.442695, %v692_v26  ;;  %1079 = vadd.xlane.f32.xlu1 %v1078_v39  ;;  %1082 = vadd.xlane.f32.xlu0 %v1081_v1  ;;  %v546_v38 = vpop.xlane.xlu1 %545  ;;  %v1084_v9 = vadd.f32 %v3158_v54, %v3151_v61  ;;  %v4060_v61 = vld [vmem:[#allocation45_spill] sm:$0xff] }
 0x15c   : > { %4048 = vst [vmem:[#allocation31_spill] sm:$0xff] %v3176_v3  ;;  %v543_v11 = vpop.xlane.xlu0 %542  ;;  %v3178_v58 = vpop.eup %1795  ;;  %1821 = vpow2.f32 %v895_v18  ;;  %v697_v27 = vsub.f32 %v4050_v49, %v546_v38  ;;  %v698_v5 = vsub.f32 %v4051_v6, %v546_v38 }
 0x15d   : > { %4049 = vst [vmem:[#allocation32_spill] sm:$0xff] %v3178_v58  ;;  %v695_v17 = vsub.f32 %v4052_v32, %v543_v11  ;;  %v3183_v25 = vpop.eup %1797  ;;  %1823 = vpow2.f32 %v897_v22  ;;  %v696_v43 = vsub.f32 %v4054_v55, %v543_v11  ;;  %v1087_v26 = vadd.f32 %v3178_v58, %v3176_v3  ;;  %v4058_v55 = vld [vmem:[#allocation43_spill] sm:$0xff]  ;;  %v4059_v58 = vld [vmem:[#allocation44_spill] sm:$0xff] }
 0x15e   : > { %4053 = vst [vmem:[#allocation33_spill] sm:$0xff] %v3183_v25  ;;  %v3190_v39 = vpop.eup %1799  ;;  %1825 = vpow2.f32 %v891_v46  ;;  %v903_v1 = vmul.f32 1.442695, %v697_v27  ;;  %v905_v18 = vmul.f32 1.442695, %v698_v5  ;;  %v4062_v5 = vld [vmem:[#allocation46_spill] sm:$0xff] }
 0x15f   : > { %4055 = vst [vmem:[#allocation34_spill] sm:$0xff] %v3190_v39  ;;  %v899_v49 = vmul.f32 1.442695, %v695_v17  ;;  %v3192_v6 = vpop.eup %1801  ;;  %1827 = vpow2.f32 %v893_v34  ;;  %v901_v32 = vmul.f32 1.442695, %v696_v43  ;;  %1085 = vadd.xlane.f32.xlu1 %v1084_v9  ;;  %1088 = vadd.xlane.f32.xlu0 %v1087_v26  ;;  %v552_v22 = vpop.xlane.xlu1 %551  ;;  %v1090_v34 = vadd.f32 %v3174_v50, %v3167_v53  ;;  %v4068_v53 = vld [vmem:[#allocation49_spill] sm:$0xff] }
 0x160   : > { %4056 = vst [vmem:[#allocation35_spill] sm:$0xff] %v3192_v6  ;;  %v549_v38 = vpop.xlane.xlu0 %548  ;;  %v3194_v11 = vpop.eup %1803  ;;  %1829 = vpow2.f32 %v903_v1  ;;  %v701_v54 = vsub.f32 %v4058_v55, %v552_v22  ;;  %v702_v3 = vsub.f32 %v4059_v58, %v552_v22 }
 0x161   : > { %4057 = vst [vmem:[#allocation36_spill] sm:$0xff] %v3194_v11  ;;  %v699_v46 = vsub.f32 %v4060_v61, %v549_v38  ;;  %v3199_v27 = vpop.eup %1805  ;;  %1831 = vpow2.f32 %v905_v18  ;;  %v700_v17 = vsub.f32 %v4062_v5, %v549_v38  ;;  %v1093_v43 = vadd.f32 %v3194_v11, %v3192_v6  ;;  %v4066_v5 = vld [vmem:[#allocation47_spill] sm:$0xff]  ;;  %v4067_v11 = vld [vmem:[#allocation48_spill] sm:$0xff] }
 0x162   : > { %4061 = vst [vmem:[#allocation37_spill] sm:$0xff] %v3199_v27  ;;  %v3206_v9 = vpop.eup %1807  ;;  %1833 = vpow2.f32 %v899_v49  ;;  %v911_v26 = vmul.f32 1.442695, %v701_v54  ;;  %v913_v1 = vmul.f32 1.442695, %v702_v3  ;;  %v4070_v3 = vld [vmem:[#allocation50_spill] sm:$0xff] }
 0x163   : > { %4063 = vst [vmem:[#allocation38_spill] sm:$0xff] %v3206_v9  ;;  %v907_v55 = vmul.f32 1.442695, %v699_v46  ;;  %v3208_v58 = vpop.eup %1809  ;;  %1835 = vpow2.f32 %v901_v32  ;;  %v909_v61 = vmul.f32 1.442695, %v700_v17  ;;  %1091 = vadd.xlane.f32.xlu1 %v1090_v34  ;;  %1094 = vadd.xlane.f32.xlu0 %v1093_v43  ;;  %v558_v18 = vpop.xlane.xlu1 %557  ;;  %v1096_v32 = vadd.f32 %v3190_v39, %v3183_v25  ;;  %v4076_v25 = vld [vmem:[#allocation53_spill] sm:$0xff] }
 0x164   : > { %4064 = vst [vmem:[#allocation39_spill] sm:$0xff] %v3208_v58  ;;  %v555_v22 = vpop.xlane.xlu0 %554  ;;  %v3210_v38 = vpop.eup %1811  ;;  %1837 = vpow2.f32 %v911_v26  ;;  %v705_v50 = vsub.f32 %v4066_v5, %v558_v18  ;;  %v706_v6 = vsub.f32 %v4067_v11, %v558_v18 }
 0x165   : > { %4065 = vst [vmem:[#allocation40_spill] sm:$0xff] %v3210_v38  ;;  %v703_v49 = vsub.f32 %v4068_v53, %v555_v22  ;;  %v3215_v54 = vpop.eup %1813  ;;  %1839 = vpow2.f32 %v913_v1  ;;  %v704_v46 = vsub.f32 %v4070_v3, %v555_v22  ;;  %v1099_v17 = vadd.f32 %v3210_v38, %v3208_v58  ;;  %v4074_v3 = vld [vmem:[#allocation51_spill] sm:$0xff]  ;;  %v4075_v38 = vld [vmem:[#allocation52_spill] sm:$0xff] }
 0x166   : > { %4069 = vst [vmem:[#allocation41_spill] sm:$0xff] %v3215_v54  ;;  %v3222_v34 = vpop.eup %1815  ;;  %1841 = vpow2.f32 %v907_v55  ;;  %v919_v43 = vmul.f32 1.442695, %v705_v50  ;;  %v921_v26 = vmul.f32 1.442695, %v706_v6  ;;  %v4078_v6 = vld [vmem:[#allocation54_spill] sm:$0xff] }
 0x167   : > { %4071 = vst [vmem:[#allocation42_spill] sm:$0xff] %v3222_v34  ;;  %v915_v5 = vmul.f32 1.442695, %v703_v49  ;;  %v3224_v11 = vpop.eup %1817  ;;  %1843 = vpow2.f32 %v909_v61  ;;  %v917_v53 = vmul.f32 1.442695, %v704_v46  ;;  %1097 = vadd.xlane.f32.xlu1 %v1096_v32  ;;  %1100 = vadd.xlane.f32.xlu0 %v1099_v17  ;;  %v564_v1 = vpop.xlane.xlu1 %563  ;;  %v1102_v61 = vadd.f32 %v3206_v9, %v3199_v27  ;;  %v4084_v27 = vld [vmem:[#allocation57_spill] sm:$0xff] }
 0x168   : > { %4072 = vst [vmem:[#allocation43_spill] sm:$0xff] %v3224_v11  ;;  %v561_v18 = vpop.xlane.xlu0 %560  ;;  %v3226_v22 = vpop.eup %1819  ;;  %1845 = vpow2.f32 %v919_v43  ;;  %v709_v39 = vsub.f32 %v4074_v3, %v564_v1  ;;  %v710_v58 = vsub.f32 %v4075_v38, %v564_v1 }
 0x169   : > { %4073 = vst [vmem:[#allocation44_spill] sm:$0xff] %v3226_v22  ;;  %v707_v55 = vsub.f32 %v4076_v25, %v561_v18  ;;  %v3231_v50 = vpop.eup %1821  ;;  %1847 = vpow2.f32 %v921_v26  ;;  %v708_v49 = vsub.f32 %v4078_v6, %v561_v18  ;;  %v1105_v46 = vadd.f32 %v3226_v22, %v3224_v11  ;;  %v4082_v6 = vld [vmem:[#allocation55_spill] sm:$0xff]  ;;  %v4083_v22 = vld [vmem:[#allocation56_spill] sm:$0xff] }
 0x16a   : > { %4077 = vst [vmem:[#allocation45_spill] sm:$0xff] %v3231_v50  ;;  %v3238_v32 = vpop.eup %1823  ;;  %1849 = vpow2.f32 %v915_v5  ;;  %v927_v17 = vmul.f32 1.442695, %v709_v39  ;;  %v929_v43 = vmul.f32 1.442695, %v710_v58  ;;  %v4086_v58 = vld [vmem:[#allocation58_spill] sm:$0xff] }
 0x16b   : > { %4079 = vst [vmem:[#allocation46_spill] sm:$0xff] %v3238_v32  ;;  %v923_v3 = vmul.f32 1.442695, %v707_v55  ;;  %v3240_v38 = vpop.eup %1825  ;;  %1851 = vpow2.f32 %v917_v53  ;;  %v925_v25 = vmul.f32 1.442695, %v708_v49  ;;  %1103 = vadd.xlane.f32.xlu1 %v1102_v61  ;;  %1106 = vadd.xlane.f32.xlu0 %v1105_v46  ;;  %v570_v26 = vpop.xlane.xlu1 %569  ;;  %v1108_v53 = vadd.f32 %v3222_v34, %v3215_v54  ;;  %v4092_v54 = vld [vmem:[#allocation61_spill] sm:$0xff] }
 0x16c   : > { %4080 = vst [vmem:[#allocation47_spill] sm:$0xff] %v3240_v38  ;;  %v567_v1 = vpop.xlane.xlu0 %566  ;;  %v3242_v18 = vpop.eup %1827  ;;  %1853 = vpow2.f32 %v927_v17  ;;  %v713_v9 = vsub.f32 %v4082_v6, %v570_v26  ;;  %v714_v11 = vsub.f32 %v4083_v22, %v570_v26 }
 0x16d   : > { %4081 = vst [vmem:[#allocation48_spill] sm:$0xff] %v3242_v18  ;;  %v711_v5 = vsub.f32 %v4084_v27, %v567_v1  ;;  %v3247_v39 = vpop.eup %1829  ;;  %1855 = vpow2.f32 %v929_v43  ;;  %v712_v55 = vsub.f32 %v4086_v58, %v567_v1  ;;  %v1111_v49 = vadd.f32 %v3242_v18, %v3240_v38  ;;  %v4090_v58 = vld [vmem:[#allocation59_spill] sm:$0xff]  ;;  %v4091_v18 = vld [vmem:[#allocation60_spill] sm:$0xff] }
 0x16e   : > { %4085 = vst [vmem:[#allocation49_spill] sm:$0xff] %v3247_v39  ;;  %v3254_v61 = vpop.eup %1831  ;;  %1857 = vpow2.f32 %v923_v3  ;;  %v935_v46 = vmul.f32 1.442695, %v713_v9  ;;  %v937_v17 = vmul.f32 1.442695, %v714_v11  ;;  %v4094_v11 = vld [vmem:[#allocation62_spill] sm:$0xff] }
 0x16f   : > { %4087 = vst [vmem:[#allocation50_spill] sm:$0xff] %v3254_v61  ;;  %v931_v6 = vmul.f32 1.442695, %v711_v5  ;;  %v3256_v22 = vpop.eup %1833  ;;  %1859 = vpow2.f32 %v925_v25  ;;  %v933_v27 = vmul.f32 1.442695, %v712_v55  ;;  %1109 = vadd.xlane.f32.xlu1 %v1108_v53  ;;  %1112 = vadd.xlane.f32.xlu0 %v1111_v49  ;;  %v576_v43 = vpop.xlane.xlu1 %575  ;;  %v1114_v25 = vadd.f32 %v3238_v32, %v3231_v50  ;;  %v4100_v50 = vld [vmem:[#allocation65_spill] sm:$0xff] }
 0x170   : > { %4088 = vst [vmem:[#allocation51_spill] sm:$0xff] %v3256_v22  ;;  %v573_v26 = vpop.xlane.xlu0 %572  ;;  %v3258_v1 = vpop.eup %1835  ;;  %1861 = vpow2.f32 %v935_v46  ;;  %v717_v34 = vsub.f32 %v4090_v58, %v576_v43  ;;  %v718_v38 = vsub.f32 %v4091_v18, %v576_v43 }
 0x171   : > { %4089 = vst [vmem:[#allocation52_spill] sm:$0xff] %v3258_v1  ;;  %v715_v3 = vsub.f32 %v4092_v54, %v573_v26  ;;  %v3263_v9 = vpop.eup %1837  ;;  %1863 = vpow2.f32 %v937_v17  ;;  %v716_v5 = vsub.f32 %v4094_v11, %v573_v26  ;;  %v1117_v55 = vadd.f32 %v3258_v1, %v3256_v22  ;;  %v4098_v11 = vld [vmem:[#allocation63_spill] sm:$0xff]  ;;  %v4099_v1 = vld [vmem:[#allocation64_spill] sm:$0xff] }
 0x172   : > { %4093 = vst [vmem:[#allocation53_spill] sm:$0xff] %v3263_v9  ;;  %v3270_v53 = vpop.eup %1839  ;;  %1865 = vpow2.f32 %v931_v6  ;;  %v943_v49 = vmul.f32 1.442695, %v717_v34  ;;  %v945_v46 = vmul.f32 1.442695, %v718_v38  ;;  %v4102_v38 = vld [vmem:[#allocation66_spill] sm:$0xff] }
 0x173   : > { %4095 = vst [vmem:[#allocation54_spill] sm:$0xff] %v3270_v53  ;;  %v939_v58 = vmul.f32 1.442695, %v715_v3  ;;  %v3272_v18 = vpop.eup %1841  ;;  %1867 = vpow2.f32 %v933_v27  ;;  %v941_v54 = vmul.f32 1.442695, %v716_v5  ;;  %1115 = vadd.xlane.f32.xlu1 %v1114_v25  ;;  %1118 = vadd.xlane.f32.xlu0 %v1117_v55  ;;  %v582_v17 = vpop.xlane.xlu1 %581  ;;  %v1120_v27 = vadd.f32 %v3254_v61, %v3247_v39  ;;  %v4108_v39 = vld [vmem:[#allocation69_spill] sm:$0xff] }
 0x174   : > { %4096 = vst [vmem:[#allocation55_spill] sm:$0xff] %v3272_v18  ;;  %v579_v43 = vpop.xlane.xlu0 %578  ;;  %v3274_v26 = vpop.eup %1843  ;;  %1869 = vpow2.f32 %v943_v49  ;;  %v721_v32 = vsub.f32 %v4098_v11, %v582_v17  ;;  %v722_v22 = vsub.f32 %v4099_v1, %v582_v17 }
 0x175   : > { %4097 = vst [vmem:[#allocation56_spill] sm:$0xff] %v3274_v26  ;;  %v719_v6 = vsub.f32 %v4100_v50, %v579_v43  ;;  %v3279_v34 = vpop.eup %1845  ;;  %1871 = vpow2.f32 %v945_v46  ;;  %v720_v3 = vsub.f32 %v4102_v38, %v579_v43  ;;  %v1123_v5 = vadd.f32 %v3274_v26, %v3272_v18  ;;  %v4106_v38 = vld [vmem:[#allocation67_spill] sm:$0xff]  ;;  %v4107_v26 = vld [vmem:[#allocation68_spill] sm:$0xff] }
 0x176   : > { %4101 = vst [vmem:[#allocation57_spill] sm:$0xff] %v3279_v34  ;;  %v3286_v25 = vpop.eup %1847  ;;  %1873 = vpow2.f32 %v939_v58  ;;  %v951_v55 = vmul.f32 1.442695, %v721_v32  ;;  %v953_v49 = vmul.f32 1.442695, %v722_v22  ;;  %v4110_v22 = vld [vmem:[#allocation70_spill] sm:$0xff] }
 0x177   : > { %4103 = vst [vmem:[#allocation58_spill] sm:$0xff] %v3286_v25  ;;  %v947_v11 = vmul.f32 1.442695, %v719_v6  ;;  %v3288_v1 = vpop.eup %1849  ;;  %1875 = vpow2.f32 %v941_v54  ;;  %v949_v50 = vmul.f32 1.442695, %v720_v3  ;;  %1121 = vadd.xlane.f32.xlu1 %v1120_v27  ;;  %1124 = vadd.xlane.f32.xlu0 %v1123_v5  ;;  %v588_v46 = vpop.xlane.xlu1 %587  ;;  %v1126_v54 = vadd.f32 %v3270_v53, %v3263_v9  ;;  %v4116_v9 = vld [vmem:[#allocation73_spill] sm:$0xff] }
 0x178   : > { %4104 = vst [vmem:[#allocation59_spill] sm:$0xff] %v3288_v1  ;;  %v585_v17 = vpop.xlane.xlu0 %584  ;;  %v3290_v43 = vpop.eup %1851  ;;  %1877 = vpow2.f32 %v951_v55  ;;  %v725_v61 = vsub.f32 %v4106_v38, %v588_v46  ;;  %v726_v18 = vsub.f32 %v4107_v26, %v588_v46 }
 0x179   : > { %4105 = vst [vmem:[#allocation60_spill] sm:$0xff] %v3290_v43  ;;  %v723_v58 = vsub.f32 %v4108_v39, %v585_v17  ;;  %v3295_v32 = vpop.eup %1853  ;;  %1879 = vpow2.f32 %v953_v49  ;;  %v724_v6 = vsub.f32 %v4110_v22, %v585_v17  ;;  %v1129_v3 = vadd.f32 %v3290_v43, %v3288_v1  ;;  %v4114_v22 = vld [vmem:[#allocation71_spill] sm:$0xff]  ;;  %v4115_v43 = vld [vmem:[#allocation72_spill] sm:$0xff] }
 0x17a   : > { %4109 = vst [vmem:[#allocation61_spill] sm:$0xff] %v3295_v32  ;;  %v3302_v27 = vpop.eup %1855  ;;  %1881 = vpow2.f32 %v947_v11  ;;  %v959_v5 = vmul.f32 1.442695, %v725_v61  ;;  %v961_v55 = vmul.f32 1.442695, %v726_v18  ;;  %v4117_v18 = vld [vmem:[#allocation74_spill] sm:$0xff] }
 0x17b   : > { %4111 = vst [vmem:[#allocation62_spill] sm:$0xff] %v3302_v27  ;;  %v955_v38 = vmul.f32 1.442695, %v723_v58  ;;  %v3304_v26 = vpop.eup %1857  ;;  %1883 = vpow2.f32 %v949_v50  ;;  %v957_v39 = vmul.f32 1.442695, %v724_v6  ;;  %1127 = vadd.xlane.f32.xlu1 %v1126_v54  ;;  %1130 = vadd.xlane.f32.xlu0 %v1129_v3  ;;  %v594_v49 = vpop.xlane.xlu1 %593  ;;  %v1132_v50 = vadd.f32 %v3286_v25, %v3279_v34  ;;  %v4123_v34 = vld [vmem:[#allocation77_spill] sm:$0xff] }
 0x17c   : > { %4112 = vst [vmem:[#allocation63_spill] sm:$0xff] %v3304_v26  ;;  %v591_v46 = vpop.xlane.xlu0 %590  ;;  %v3306_v17 = vpop.eup %1859  ;;  %1885 = vpow2.f32 %v959_v5  ;;  %v729_v53 = vsub.f32 %v4114_v22, %v594_v49  ;;  %v730_v1 = vsub.f32 %v4115_v43, %v594_v49 }
 0x17d   : > { %4113 = vst [vmem:[#allocation64_spill] sm:$0xff] %v3306_v17  ;;  %v727_v11 = vsub.f32 %v4116_v9, %v591_v46  ;;  %v3311_v61 = vpop.eup %1861  ;;  %1887 = vpow2.f32 %v961_v55  ;;  %v728_v58 = vsub.f32 %v4117_v18, %v591_v46  ;;  %v1135_v6 = vadd.f32 %v3306_v17, %v3304_v26  ;;  %v4121_v18 = vld [vmem:[#allocation75_spill] sm:$0xff]  ;;  %v4122_v17 = vld [vmem:[#allocation76_spill] sm:$0xff] }
 0x17e   : > { %v3318_v54 = vpop.eup %1863  ;;  %1889 = vpow2.f32 %v955_v38  ;;  %v967_v3 = vmul.f32 1.442695, %v729_v53  ;;  %v969_v5 = vmul.f32 1.442695, %v730_v1  ;;  %v4125_v1 = vld [vmem:[#allocation78_spill] sm:$0xff] }
 0x17f   : > { %4118 = vst [vmem:[#allocation65_spill] sm:$0xff] %v3318_v54  ;;  %v963_v22 = vmul.f32 1.442695, %v727_v11  ;;  %v3320_v43 = vpop.eup %1865  ;;  %1891 = vpow2.f32 %v957_v39  ;;  %v965_v9 = vmul.f32 1.442695, %v728_v58  ;;  %1133 = vadd.xlane.f32.xlu1 %v1132_v50  ;;  %1136 = vadd.xlane.f32.xlu0 %v1135_v6  ;;  %v600_v55 = vpop.xlane.xlu1 %599  ;;  %v1138_v39 = vadd.f32 %v3302_v27, %v3295_v32  ;;  %v4129_v27 = vld [vmem:[#allocation79_spill] sm:$0xff] }
 0x180   : > { %4119 = vst [vmem:[#allocation66_spill] sm:$0xff] %v3320_v43  ;;  %v597_v49 = vpop.xlane.xlu0 %596  ;;  %v3322_v46 = vpop.eup %1867  ;;  %1893 = vpow2.f32 %v967_v3  ;;  %v733_v25 = vsub.f32 %v4121_v18, %v600_v55  ;;  %v734_v26 = vsub.f32 %v4122_v17, %v600_v55 }
 0x181   : > { %4120 = vst [vmem:[#allocation67_spill] sm:$0xff] %v3322_v46  ;;  %v731_v38 = vsub.f32 %v4123_v34, %v597_v49  ;;  %v3327_v53 = vpop.eup %1869  ;;  %1895 = vpow2.f32 %v969_v5  ;;  %v732_v11 = vsub.f32 %v4125_v1, %v597_v49  ;;  %v1141_v58 = vadd.f32 %v3322_v46, %v3320_v43  ;;  %v4130_v43 = vld [vmem:[#allocation80_spill] sm:$0xff] }
 0x182   : > { %4124 = vst [vmem:[#allocation68_spill] sm:$0xff] %v3327_v53  ;;  %v3334_v50 = vpop.eup %1871  ;;  %1897 = vpow2.f32 %v963_v22  ;;  %v975_v6 = vmul.f32 1.442695, %v733_v25  ;;  %v977_v49 = vmul.f32 1.442695, %v734_v26  ;;  %v4131_v25 = vld [vmem:[#allocation81_spill] sm:$0xff] }
 0x183   : > { %4126 = vst [vmem:[#allocation69_spill] sm:$0xff] %v3334_v50  ;;  %v971_v3 = vmul.f32 1.442695, %v731_v38  ;;  %v3336_v18 = vpop.eup %1873  ;;  %1899 = vpow2.f32 %v965_v9  ;;  %v973_v34 = vmul.f32 1.442695, %v732_v11  ;;  %1139 = vadd.xlane.f32.xlu1 %v1138_v39  ;;  %1142 = vadd.xlane.f32.xlu0 %v1141_v58  ;;  %v606_v17 = vpop.xlane.xlu1 %605  ;;  %v1144_v9 = vadd.f32 %v3318_v54, %v3311_v61 }
 0x184   : > { %4127 = vst [vmem:[#allocation70_spill] sm:$0xff] %v3336_v18  ;;  %v603_v5 = vpop.xlane.xlu0 %602  ;;  %v3338_v55 = vpop.eup %1875  ;;  %v737_v1 = vsub.f32 %v2873_v33, %v606_v17  ;;  %v738_v46 = vsub.f32 %v4129_v27, %v606_v17  ;;  %1901 = vpow2.f32 %v975_v6  ;;  %v1150_v17 = vadd.f32 %v3334_v50, %v3327_v53 }
 0x185   : > { %4128 = vst [vmem:[#allocation71_spill] sm:$0xff] %v3338_v55  ;;  %v735_v32 = vsub.f32 %v4130_v43, %v603_v5  ;;  %v3343_v22 = vpop.eup %1877  ;;  %v736_v38 = vsub.f32 %v4131_v25, %v603_v5  ;;  %v1147_v11 = vadd.f32 %v3338_v55, %v3336_v18  ;;  %1903 = vpow2.f32 %v971_v3  ;;  %v4135_v3 = vld [vmem:[#allocation83_spill] sm:$0xff] }
 0x186   : > { %v3350_v39 = vpop.eup %1879  ;;  %v983_v26 = vmul.f32 1.442695, %v737_v1  ;;  %1905 = vpow2.f32 %v973_v34  ;;  %v985_v25 = vmul.f32 1.442695, %v738_v46  ;;  %v4136_v34 = vld [vmem:[#allocation82_spill] sm:$0xff] }
 0x187   : > { %4132 = vst [vmem:[#allocation72_spill] sm:$0xff] %v3350_v39  ;;  %v979_v33 = vmul.f32 1.442695, %v735_v32  ;;  %v3352_v58 = vpop.eup %1881  ;;  %v981_v27 = vmul.f32 1.442695, %v736_v38  ;;  %1145 = vadd.xlane.f32.xlu1 %v1144_v9  ;;  %1148 = vadd.xlane.f32.xlu0 %v1147_v11  ;;  %v612_v43 = vpop.xlane.xlu1 %611  ;;  %1907 = vpow2.f32 %v977_v49  ;;  %v4137_v9 = vld [vmem:[#allocation84_spill] sm:$0xff] }
 0x188   : > { %4133 = vst [vmem:[#allocation73_spill] sm:$0xff] %v3352_v58  ;;  %v609_v6 = vpop.xlane.xlu0 %608  ;;  %v3356_v5 = vpop.eup %1883  ;;  %v741_v55 = vsub.f32 %v2891_v47, %v612_v43  ;;  %1909 = vpow2.f32 %v983_v26  ;;  %v742_v38 = vsub.f32 %v4136_v34, %v612_v43  ;;  %v1156_v26 = vadd.f32 %v3350_v39, %v3343_v22  ;;  %v4138_v34 = vld [vmem:[#allocation85_spill] sm:$0xff] }
 0x189   : > { %4134 = vst [vmem:[#allocation74_spill] sm:$0xff] %v3356_v5  ;;  %v739_v1 = vsub.f32 %v4135_v3, %v609_v6  ;;  %v3360_v32 = vpop.eup %1885  ;;  %v740_v11 = vsub.f32 %v4137_v9, %v609_v6  ;;  %v1153_v18 = vadd.f32 %v3356_v5, %v3352_v58  ;;  %1911 = vpow2.f32 %v979_v33 }
 0x18a   : > { %v3366_v54 = vpop.eup %1887  ;;  %1913 = vpow2.f32 %v981_v27  ;;  %v991_v6 = vmul.f32 1.442695, %v741_v55  ;;  %v993_v5 = vmul.f32 1.442695, %v742_v38  ;;  %v4139_v27 = vld [vmem:[#allocation86_spill] sm:$0xff] }
 0x18b   : > { %v987_v50 = vmul.f32 1.442695, %v739_v1  ;;  %v3368_v49 = vpop.eup %1889  ;;  %v989_v47 = vmul.f32 1.442695, %v740_v11  ;;  %1151 = vadd.xlane.f32.xlu1 %v1150_v17  ;;  %1154 = vadd.xlane.f32.xlu0 %v1153_v18  ;;  %v618_v46 = vpop.xlane.xlu1 %617  ;;  %1915 = vpow2.f32 %v985_v25  ;;  %v4140_v17 = vld [vmem:[#allocation87_spill] sm:$0xff] }
 0x18c   : > { %v615_v3 = vpop.xlane.xlu0 %614  ;;  %v3372_v43 = vpop.eup %1891  ;;  %v745_v9 = vsub.f32 %v4138_v34, %v618_v46  ;;  %v746_v11 = vsub.f32 %v4139_v27, %v618_v46 }
 0x18d   : > { %v743_v33 = vsub.f32 %v2921_v41, %v615_v3  ;;  %v3376_v1 = vpop.eup %1893  ;;  %v744_v18 = vsub.f32 %v4140_v17, %v615_v3  ;;  %v1159_v58 = vadd.f32 %v3372_v43, %v3368_v49  ;;  %1917 = vpow2.f32 %v987_v50 }
 0x18e   : > { %v3382_v53 = vpop.eup %1895  ;;  %1919 = vpow2.f32 %v989_v47  ;;  %v999_v38 = vmul.f32 1.442695, %v745_v9  ;;  %v1001_v46 = vmul.f32 1.442695, %v746_v11  ;;  %v1162_v3 = vadd.f32 %v3366_v54, %v3360_v32 }
 0x18f   : > { %v995_v39 = vmul.f32 1.442695, %v743_v33  ;;  %v3384_v25 = vpop.eup %1897  ;;  %v997_v55 = vmul.f32 1.442695, %v744_v18  ;;  %1157 = vadd.xlane.f32.xlu1 %v1156_v26  ;;  %1160 = vadd.xlane.f32.xlu0 %v1159_v58  ;;  %1921 = vpow2.f32 %v991_v6 }
 0x190   : > { %v3386_v41 = vpop.eup %1899  ;;  %1923 = vpow2.f32 %v993_v5  ;;  %v1168_v5 = vadd.f32 %v3382_v53, %v3376_v1 }
 0x191   : > { %v1165_v34 = vadd.f32 %v3386_v41, %v3384_v25  ;;  %v3392_v50 = vpop.eup %1901  ;;  %1925 = vpow2.f32 %v995_v39 }
 0x192   : > { %v3394_v33 = vpop.eup %1903  ;;  %1927 = vpow2.f32 %v997_v55 }
 0x193   : > { %1163 = vadd.xlane.f32.xlu1 %v1162_v3  ;;  %1166 = vadd.xlane.f32.xlu0 %v1165_v34  ;;  %v3396_v58 = vpop.eup %1905  ;;  %1929 = vpow2.f32 %v999_v38 }
 0x194   : > { %v3398_v47 = vpop.eup %1907  ;;  %1931 = vpow2.f32 %v1001_v46  ;;  %v1171_v26 = vadd.f32 %v3396_v58, %v3394_v33 }
 0x195   : > { %v3404_v6 = vpop.eup %1909  ;;  %v1174_v11 = vadd.f32 %v3398_v47, %v3392_v50 }
 0x196   : > { %4141 = vst [vmem:[#allocation75_spill] sm:$0xff] %v3404_v6  ;;  %v3406_v39 = vpop.eup %1911 }
 0x197   : > { %1169 = vadd.xlane.f32.xlu1 %v1168_v5  ;;  %1172 = vadd.xlane.f32.xlu0 %v1171_v26  ;;  %v3408_v9 = vpop.eup %1913 }
 0x198   : > { %4142 = vst [vmem:[#allocation76_spill] sm:$0xff] %v3408_v9  ;;  %v3410_v27 = vpop.eup %1915  ;;  %v1177_v17 = vadd.f32 %v3408_v9, %v3406_v39 }
 0x199   : > { %4143 = vst [vmem:[#allocation77_spill] sm:$0xff] %v3410_v27  ;;  %v1180_v46 = vadd.f32 %v3410_v27, %v3404_v6 }
 0x19a   : > { %v3416_v18 = vpop.eup %1917 }
 0x19b   : > { %4144 = vst [vmem:[#allocation78_spill] sm:$0xff] %v3416_v18  ;;  %1175 = vadd.xlane.f32.xlu1 %v1174_v11  ;;  %1178 = vadd.xlane.f32.xlu0 %v1177_v17  ;;  %v3418_v55 = vpop.eup %1919 }
 0x19c   : > { %4145 = vst [vmem:[#allocation79_spill] sm:$0xff] %v3418_v55  ;;  %v3420_v38 = vpop.eup %1921  ;;  %v1183_v3 = vadd.f32 %v3418_v55, %v3416_v18 }
 0x19d   : > { %v3426_v34 = vpop.eup %1923 }
 0x19e   : > { %4146 = vst [vmem:[#allocation80_spill] sm:$0xff] %v3426_v34  ;;  %v3428_v5 = vpop.eup %1925  ;;  %v1186_v17 = vadd.f32 %v3426_v34, %v3420_v38 }
 0x19f   : > { %4147 = vst [vmem:[#allocation81_spill] sm:$0xff] %v3428_v5  ;;  %1181 = vadd.xlane.f32.xlu1 %v1180_v46  ;;  %1184 = vadd.xlane.f32.xlu0 %v1183_v3  ;;  %v3430_v26 = vpop.eup %1927 }
 0x1a0   : > { %4148 = vst [vmem:[#allocation83_spill] sm:$0xff] %v3430_v26  ;;  %v3432_v11 = vpop.eup %1929  ;;  %v1189_v9 = vadd.f32 %v3430_v26, %v3428_v5 }
 0x1a1   : > { %v3438_v27 = vpop.eup %1931 }
 0x1a2   : > { %4149 = vst [vmem:[#allocation82_spill] sm:$0xff] %v3438_v27  ;;  %v1192_v55 = vadd.f32 %v3438_v27, %v3432_v11 }
 0x1a3   : > { %1187 = vadd.xlane.f32.xlu1 %v1186_v17  ;;  %1190 = vadd.xlane.f32.xlu0 %v1189_v9 }
 0x1a7   : > { %1193 = vadd.xlane.f32.xlu1 %v1192_v55 }
 0x1b0   : > { %v1005_v46 = vpop.xlane.xlu0 %1004 }
 0x1b1   : > { %1933 = vrcp.f32 %v1005_v46 }
 0x1b4   : > { %v1008_v3 = vpop.xlane.xlu1 %1007  ;;  %v1011_v18 = vpop.xlane.xlu0 %1010 }
 0x1b5   : > { %1935 = vrcp.f32 %v1008_v3 }
 0x1b6   : > { %1937 = vrcp.f32 %v1011_v18 }
 0x1b8   : > { %v1014_v6 = vpop.xlane.xlu1 %1013  ;;  %v1017_v34 = vpop.xlane.xlu0 %1016 }
 0x1b9   : > { %1939 = vrcp.f32 %v1014_v6 }
 0x1ba   : > { %1941 = vrcp.f32 %v1017_v34 }
 0x1bc   : > { %v1020_v26 = vpop.xlane.xlu1 %1019  ;;  %v1023_v5 = vpop.xlane.xlu0 %1022 }
 0x1bd   : > { %1943 = vrcp.f32 %v1020_v26 }
 0x1be   : > { %v1934_v17 = vpop.eup %1933  ;;  %1945 = vrcp.f32 %v1023_v5 }
 0x1bf   : > { %v1259_v9 = vmul.f32 %v1934_v17, %v2954_v0  ;;  %v1260_v55 = vmul.f32 %v1934_v17, %v2956_v48 }
 0x1c0   : > { %v1026_v27 = vpop.xlane.xlu1 %1025  ;;  %v1029_v46 = vpop.xlane.xlu0 %1028 }
 0x1c1   : > { %1387 = vst [vmem:[%s3446_s21] sm:$0xff] %v1259_v9  ;;  %1388 = vst [vmem:[%s3446_s21 + $0x8] sm:$0xff] %v1260_v55  ;;  %1947 = vrcp.f32 %v1026_v27 }
 0x1c2   : > { %v1936_v6 = vpop.eup %1935  ;;  %1949 = vrcp.f32 %v1029_v46 }
 0x1c3   : > { %v1938_v18 = vpop.eup %1937  ;;  %v1261_v0 = vmul.f32 %v1936_v6, %v2968_v45  ;;  %v1262_v48 = vmul.f32 %v1936_v6, %v2970_v8 }
 0x1c4   : > { %v1263_v34 = vmul.f32 %v1938_v18, %v2949_v12  ;;  %v1264_v5 = vmul.f32 %v1938_v18, %v2952_v40  ;;  %v1032_v26 = vpop.xlane.xlu1 %1031  ;;  %v1035_v3 = vpop.xlane.xlu0 %1034 }
 0x1c5   : > { %1389 = vst [vmem:[%s3446_s21 + $0x10] sm:$0xff] %v1261_v0  ;;  %1390 = vst [vmem:[%s3446_s21 + $0x18] sm:$0xff] %v1262_v48  ;;  %1951 = vrcp.f32 %v1032_v26 }
 0x1c6   : > { %v1940_v27 = vpop.eup %1939  ;;  %1391 = vst [vmem:[%s3446_s21 + $0x20] sm:$0xff] %v1263_v34  ;;  %1392 = vst [vmem:[%s3446_s21 + $0x28] sm:$0xff] %v1264_v5  ;;  %1953 = vrcp.f32 %v1035_v3 }
 0x1c7   : > { %v1942_v45 = vpop.eup %1941  ;;  %v1265_v8 = vmul.f32 %v1940_v27, %v2961_v16  ;;  %v1266_v12 = vmul.f32 %v1940_v27, %v2966_v23 }
 0x1c8   : > { %v1267_v40 = vmul.f32 %v1942_v45, %v2984_v4  ;;  %v1268_v17 = vmul.f32 %v1942_v45, %v2986_v35  ;;  %v1038_v9 = vpop.xlane.xlu1 %1037  ;;  %v1041_v55 = vpop.xlane.xlu0 %1040 }
 0x1c9   : > { %1393 = vst [vmem:[%s3446_s21 + $0x30] sm:$0xff] %v1265_v8  ;;  %1394 = vst [vmem:[%s3446_s21 + $0x38] sm:$0xff] %v1266_v12  ;;  %1955 = vrcp.f32 %v1038_v9 }
 0x1ca   : > { %v1944_v46 = vpop.eup %1943  ;;  %1395 = vst [vmem:[%s3446_s21 + $0x40] sm:$0xff] %v1267_v40  ;;  %1396 = vst [vmem:[%s3446_s21 + $0x48] sm:$0xff] %v1268_v17  ;;  %1957 = vrcp.f32 %v1041_v55 }
 0x1cb   : > { %v1946_v16 = vpop.eup %1945  ;;  %v1269_v23 = vmul.f32 %v1944_v46, %v2975_v29  ;;  %v1270_v4 = vmul.f32 %v1944_v46, %v2982_v52 }
 0x1cc   : > { %v1271_v35 = vmul.f32 %v1946_v16, %v3000_v21  ;;  %v1272_v6 = vmul.f32 %v1946_v16, %v3002_v19  ;;  %v1044_v18 = vpop.xlane.xlu1 %1043  ;;  %v1047_v0 = vpop.xlane.xlu0 %1046 }
 0x1cd   : > { %1397 = vst [vmem:[%s3446_s21 + $0x50] sm:$0xff] %v1269_v23  ;;  %1398 = vst [vmem:[%s3446_s21 + $0x58] sm:$0xff] %v1270_v4  ;;  %1959 = vrcp.f32 %v1044_v18 }
 0x1ce   : > { %v1948_v48 = vpop.eup %1947  ;;  %1399 = vst [vmem:[%s3446_s21 + $0x60] sm:$0xff] %v1271_v35  ;;  %1400 = vst [vmem:[%s3446_s21 + $0x68] sm:$0xff] %v1272_v6  ;;  %1961 = vrcp.f32 %v1047_v0 }
 0x1cf   : > { %v1950_v29 = vpop.eup %1949  ;;  %v1273_v52 = vmul.f32 %v1948_v48, %v2991_v14  ;;  %v1274_v21 = vmul.f32 %v1948_v48, %v2998_v63  ;;  %v4150_v48 = vld [vmem:[#allocation11_spill] sm:$0xff] }
 0x1d0   : > { %v1275_v19 = vmul.f32 %v1950_v29, %v3016_v37  ;;  %v1276_v34 = vmul.f32 %v1950_v29, %v3018_v31  ;;  %v1050_v5 = vpop.xlane.xlu1 %1049  ;;  %v1053_v26 = vpop.xlane.xlu0 %1052  ;;  %v4151_v29 = vld [vmem:[#allocation12_spill] sm:$0xff] }
 0x1d1   : > { %1401 = vst [vmem:[%s3446_s21 + $0x70] sm:$0xff] %v1273_v52  ;;  %1402 = vst [vmem:[%s3446_s21 + $0x78] sm:$0xff] %v1274_v21  ;;  %1963 = vrcp.f32 %v1050_v5  ;;  %v4152_v5 = vld [vmem:[#allocation9_spill] sm:$0xff] }
 0x1d2   : > { %v1952_v3 = vpop.eup %1951  ;;  %1403 = vst [vmem:[%s3446_s21 + $0x80] sm:$0xff] %v1275_v19  ;;  %1404 = vst [vmem:[%s3446_s21 + $0x88] sm:$0xff] %v1276_v34  ;;  %1965 = vrcp.f32 %v1053_v26  ;;  %v4153_v26 = vld [vmem:[#allocation10_spill] sm:$0xff] }
 0x1d3   : > { %v1954_v14 = vpop.eup %1953  ;;  %v1277_v63 = vmul.f32 %v1952_v3, %v3007_v10  ;;  %v1278_v37 = vmul.f32 %v1952_v3, %v3014_v60 }
 0x1d4   : > { %v1279_v31 = vmul.f32 %v1954_v14, %v3032_v57  ;;  %v1280_v27 = vmul.f32 %v1954_v14, %v3034_v51  ;;  %v1056_v45 = vpop.xlane.xlu1 %1055  ;;  %v1059_v8 = vpop.xlane.xlu0 %1058  ;;  %v4154_v14 = vld [vmem:[#allocation15_spill] sm:$0xff] }
 0x1d5   : > { %1405 = vst [vmem:[%s3446_s21 + $0x90] sm:$0xff] %v1277_v63  ;;  %1406 = vst [vmem:[%s3446_s21 + $0x98] sm:$0xff] %v1278_v37  ;;  %1967 = vrcp.f32 %v1056_v45  ;;  %v4155_v37 = vld [vmem:[#allocation16_spill] sm:$0xff] }
 0x1d6   : > { %v1956_v12 = vpop.eup %1955  ;;  %1407 = vst [vmem:[%s3446_s21 + $0xa0] sm:$0xff] %v1279_v31  ;;  %1408 = vst [vmem:[%s3446_s21 + $0xa8] sm:$0xff] %v1280_v27  ;;  %1969 = vrcp.f32 %v1059_v8 }
 0x1d7   : > { %v1958_v10 = vpop.eup %1957  ;;  %v1281_v60 = vmul.f32 %v1956_v12, %v3023_v28  ;;  %v1282_v57 = vmul.f32 %v1956_v12, %v3030_v36 }
 0x1d8   : > { %v1283_v51 = vmul.f32 %v1958_v10, %v3048_v7  ;;  %v1284_v40 = vmul.f32 %v1958_v10, %v3050_v56  ;;  %v1062_v17 = vpop.xlane.xlu1 %1061  ;;  %v1065_v9 = vpop.xlane.xlu0 %1064  ;;  %v4156_v10 = vld [vmem:[#allocation13_spill] sm:$0xff] }
 0x1d9   : > { %1409 = vst [vmem:[%s3446_s21 + $0xb0] sm:$0xff] %v1281_v60  ;;  %1410 = vst [vmem:[%s3446_s21 + $0xb8] sm:$0xff] %v1282_v57  ;;  %1971 = vrcp.f32 %v1062_v17  ;;  %v4157_v57 = vld [vmem:[#allocation14_spill] sm:$0xff] }
 0x1da   : > { %v1960_v55 = vpop.eup %1959  ;;  %1411 = vst [vmem:[%s3446_s21 + $0xc0] sm:$0xff] %v1283_v51  ;;  %1412 = vst [vmem:[%s3446_s21 + $0xc8] sm:$0xff] %v1284_v40  ;;  %1973 = vrcp.f32 %v1065_v9  ;;  %v4158_v40 = vld [vmem:[#allocation19_spill] sm:$0xff]  ;;  %v4159_v9 = vld [vmem:[#allocation20_spill] sm:$0xff] }
 0x1db   : > { %v1962_v28 = vpop.eup %1961  ;;  %v1285_v36 = vmul.f32 %v1960_v55, %v3039_v15  ;;  %v1286_v7 = vmul.f32 %v1960_v55, %v3046_v20 }
 0x1dc   : > { %v1287_v56 = vmul.f32 %v1962_v28, %v3064_v44  ;;  %v1288_v46 = vmul.f32 %v1962_v28, %v3066_v13  ;;  %v1068_v16 = vpop.xlane.xlu1 %1067  ;;  %v1071_v23 = vpop.xlane.xlu0 %1070 }
 0x1dd   : > { %1413 = vst [vmem:[%s3446_s21 + $0xd0] sm:$0xff] %v1285_v36  ;;  %1414 = vst [vmem:[%s3446_s21 + $0xd8] sm:$0xff] %v1286_v7  ;;  %1975 = vrcp.f32 %v1068_v16 }
 0x1de   : > { %v1964_v4 = vpop.eup %1963  ;;  %1415 = vst [vmem:[%s3446_s21 + $0xe0] sm:$0xff] %v1287_v56  ;;  %1416 = vst [vmem:[%s3446_s21 + $0xe8] sm:$0xff] %v1288_v46  ;;  %1977 = vrcp.f32 %v1071_v23  ;;  %v4160_v46 = vld [vmem:[#allocation17_spill] sm:$0xff]  ;;  %v4161_v23 = vld [vmem:[#allocation18_spill] sm:$0xff] }
 0x1df   : > { %v1966_v15 = vpop.eup %1965  ;;  %v1289_v20 = vmul.f32 %v1964_v4, %v3055_v42  ;;  %v1290_v44 = vmul.f32 %v1964_v4, %v3062_v2 }
 0x1e0   : > { %v1291_v13 = vmul.f32 %v1966_v15, %v3080_v59  ;;  %v1292_v35 = vmul.f32 %v1966_v15, %v3082_v30  ;;  %v1074_v6 = vpop.xlane.xlu1 %1073  ;;  %v1077_v18 = vpop.xlane.xlu0 %1076  ;;  %v4162_v15 = vld [vmem:[#allocation23_spill] sm:$0xff] }
 0x1e1   : > { %1417 = vst [vmem:[%s3446_s21 + $0xf0] sm:$0xff] %v1289_v20  ;;  %1418 = vst [vmem:[%s3446_s21 + $0xf8] sm:$0xff] %v1290_v44  ;;  %1979 = vrcp.f32 %v1074_v6  ;;  %v4163_v44 = vld [vmem:[#allocation24_spill] sm:$0xff] }
 0x1e2   : > { %v1968_v0 = vpop.eup %1967  ;;  %1419 = vst [vmem:[%s3446_s21 + $0x100] sm:$0xff] %v1291_v13  ;;  %1420 = vst [vmem:[%s3446_s21 + $0x108] sm:$0xff] %v1292_v35  ;;  %1981 = vrcp.f32 %v1077_v18 }
 0x1e3   : > { %v1970_v42 = vpop.eup %1969  ;;  %v1293_v2 = vmul.f32 %v1968_v0, %v3071_v24  ;;  %v1294_v59 = vmul.f32 %v1968_v0, %v3078_v62 }
 0x1e4   : > { %v1295_v30 = vmul.f32 %v1970_v42, %v4150_v48  ;;  %v1296_v52 = vmul.f32 %v1970_v42, %v4151_v29  ;;  %v1080_v21 = vpop.xlane.xlu1 %1079  ;;  %v1083_v19 = vpop.xlane.xlu0 %1082  ;;  %v4164_v42 = vld [vmem:[#allocation21_spill] sm:$0xff] }
 0x1e5   : > { %1421 = vst [vmem:[%s3446_s21 + $0x110] sm:$0xff] %v1293_v2  ;;  %1422 = vst [vmem:[%s3446_s21 + $0x118] sm:$0xff] %v1294_v59  ;;  %1983 = vrcp.f32 %v1080_v21  ;;  %v4165_v59 = vld [vmem:[#allocation22_spill] sm:$0xff] }
 0x1e6   : > { %v1972_v34 = vpop.eup %1971  ;;  %1423 = vst [vmem:[%s3446_s21 + $0x120] sm:$0xff] %v1295_v30  ;;  %1424 = vst [vmem:[%s3446_s21 + $0x128] sm:$0xff] %v1296_v52  ;;  %1985 = vrcp.f32 %v1083_v19  ;;  %v4166_v30 = vld [vmem:[#allocation27_spill] sm:$0xff]  ;;  %v4167_v52 = vld [vmem:[#allocation28_spill] sm:$0xff] }
 0x1e7   : > { %v1974_v24 = vpop.eup %1973  ;;  %v1297_v62 = vmul.f32 %v1972_v34, %v4152_v5  ;;  %v1298_v3 = vmul.f32 %v1972_v34, %v4153_v26 }
 0x1e8   : > { %v1299_v63 = vmul.f32 %v1974_v24, %v4154_v14  ;;  %v1300_v31 = vmul.f32 %v1974_v24, %v4155_v37  ;;  %v1086_v27 = vpop.xlane.xlu1 %1085  ;;  %v1089_v45 = vpop.xlane.xlu0 %1088 }
 0x1e9   : > { %1425 = vst [vmem:[%s3446_s21 + $0x130] sm:$0xff] %v1297_v62  ;;  %1426 = vst [vmem:[%s3446_s21 + $0x138] sm:$0xff] %v1298_v3  ;;  %1987 = vrcp.f32 %v1086_v27  ;;  %v4168_v62 = vld [vmem:[#allocation25_spill] sm:$0xff]  ;;  %v4169_v3 = vld [vmem:[#allocation26_spill] sm:$0xff] }
 0x1ea   : > { %v1976_v8 = vpop.eup %1975  ;;  %1427 = vst [vmem:[%s3446_s21 + $0x140] sm:$0xff] %v1299_v63  ;;  %1428 = vst [vmem:[%s3446_s21 + $0x148] sm:$0xff] %v1300_v31  ;;  %1989 = vrcp.f32 %v1089_v45  ;;  %v4170_v63 = vld [vmem:[#allocation31_spill] sm:$0xff]  ;;  %v4171_v31 = vld [vmem:[#allocation32_spill] sm:$0xff] }
 0x1eb   : > { %v1978_v12 = vpop.eup %1977  ;;  %v1301_v60 = vmul.f32 %v1976_v8, %v4156_v10  ;;  %v1302_v51 = vmul.f32 %v1976_v8, %v4157_v57 }
 0x1ec   : > { %v1303_v17 = vmul.f32 %v1978_v12, %v4158_v40  ;;  %v1304_v55 = vmul.f32 %v1978_v12, %v4159_v9  ;;  %v1092_v28 = vpop.xlane.xlu1 %1091  ;;  %v1095_v36 = vpop.xlane.xlu0 %1094 }
 0x1ed   : > { %1429 = vst [vmem:[%s3446_s21 + $0x150] sm:$0xff] %v1301_v60  ;;  %1430 = vst [vmem:[%s3446_s21 + $0x158] sm:$0xff] %v1302_v51  ;;  %1991 = vrcp.f32 %v1092_v28  ;;  %v4172_v60 = vld [vmem:[#allocation29_spill] sm:$0xff]  ;;  %v4173_v51 = vld [vmem:[#allocation30_spill] sm:$0xff] }
 0x1ee   : > { %v1980_v7 = vpop.eup %1979  ;;  %1431 = vst [vmem:[%s3446_s21 + $0x160] sm:$0xff] %v1303_v17  ;;  %1432 = vst [vmem:[%s3446_s21 + $0x168] sm:$0xff] %v1304_v55  ;;  %1993 = vrcp.f32 %v1095_v36  ;;  %v4174_v17 = vld [vmem:[#allocation35_spill] sm:$0xff]  ;;  %v4175_v55 = vld [vmem:[#allocation36_spill] sm:$0xff] }
 0x1ef   : > { %v1982_v56 = vpop.eup %1981  ;;  %v1305_v16 = vmul.f32 %v1980_v7, %v4160_v46  ;;  %v1306_v4 = vmul.f32 %v1980_v7, %v4161_v23 }
 0x1f0   : > { %v1307_v20 = vmul.f32 %v1982_v56, %v4162_v15  ;;  %v1308_v13 = vmul.f32 %v1982_v56, %v4163_v44  ;;  %v1098_v35 = vpop.xlane.xlu1 %1097  ;;  %v1101_v6 = vpop.xlane.xlu0 %1100 }
 0x1f1   : > { %1433 = vst [vmem:[%s3446_s21 + $0x170] sm:$0xff] %v1305_v16  ;;  %1434 = vst [vmem:[%s3446_s21 + $0x178] sm:$0xff] %v1306_v4  ;;  %1995 = vrcp.f32 %v1098_v35  ;;  %v4176_v16 = vld [vmem:[#allocation33_spill] sm:$0xff]  ;;  %v4177_v4 = vld [vmem:[#allocation34_spill] sm:$0xff] }
 0x1f2   : > { %v1984_v18 = vpop.eup %1983  ;;  %1435 = vst [vmem:[%s3446_s21 + $0x180] sm:$0xff] %v1307_v20  ;;  %1436 = vst [vmem:[%s3446_s21 + $0x188] sm:$0xff] %v1308_v13  ;;  %1997 = vrcp.f32 %v1101_v6  ;;  %v4178_v20 = vld [vmem:[#allocation39_spill] sm:$0xff]  ;;  %v4179_v13 = vld [vmem:[#allocation40_spill] sm:$0xff] }
 0x1f3   : > { %v1986_v0 = vpop.eup %1985  ;;  %v1309_v2 = vmul.f32 %v1984_v18, %v4164_v42  ;;  %v1310_v48 = vmul.f32 %v1984_v18, %v4165_v59 }
 0x1f4   : > { %v1311_v29 = vmul.f32 %v1986_v0, %v4166_v30  ;;  %v1312_v21 = vmul.f32 %v1986_v0, %v4167_v52  ;;  %v1104_v19 = vpop.xlane.xlu1 %1103  ;;  %v1107_v34 = vpop.xlane.xlu0 %1106 }
 0x1f5   : > { %1437 = vst [vmem:[%s3446_s21 + $0x190] sm:$0xff] %v1309_v2  ;;  %1438 = vst [vmem:[%s3446_s21 + $0x198] sm:$0xff] %v1310_v48  ;;  %1999 = vrcp.f32 %v1104_v19  ;;  %v4180_v2 = vld [vmem:[#allocation37_spill] sm:$0xff]  ;;  %v4181_v48 = vld [vmem:[#allocation38_spill] sm:$0xff] }
 0x1f6   : > { %v1988_v24 = vpop.eup %1987  ;;  %1439 = vst [vmem:[%s3446_s21 + $0x1a0] sm:$0xff] %v1311_v29  ;;  %1440 = vst [vmem:[%s3446_s21 + $0x1a8] sm:$0xff] %v1312_v21  ;;  %2001 = vrcp.f32 %v1107_v34  ;;  %v4182_v29 = vld [vmem:[#allocation43_spill] sm:$0xff]  ;;  %v4183_v21 = vld [vmem:[#allocation44_spill] sm:$0xff] }
 0x1f7   : > { %v1990_v5 = vpop.eup %1989  ;;  %v1313_v26 = vmul.f32 %v1988_v24, %v4168_v62  ;;  %v1314_v14 = vmul.f32 %v1988_v24, %v4169_v3 }
 0x1f8   : > { %v1315_v37 = vmul.f32 %v1990_v5, %v4170_v63  ;;  %v1316_v27 = vmul.f32 %v1990_v5, %v4171_v31  ;;  %v1110_v45 = vpop.xlane.xlu1 %1109  ;;  %v1113_v8 = vpop.xlane.xlu0 %1112 }
 0x1f9   : > { %1441 = vst [vmem:[%s3446_s21 + $0x1b0] sm:$0xff] %v1313_v26  ;;  %1442 = vst [vmem:[%s3446_s21 + $0x1b8] sm:$0xff] %v1314_v14  ;;  %2003 = vrcp.f32 %v1110_v45  ;;  %v4184_v26 = vld [vmem:[#allocation41_spill] sm:$0xff]  ;;  %v4185_v14 = vld [vmem:[#allocation42_spill] sm:$0xff] }
 0x1fa   : > { %v1992_v12 = vpop.eup %1991  ;;  %1443 = vst [vmem:[%s3446_s21 + $0x1c0] sm:$0xff] %v1315_v37  ;;  %1444 = vst [vmem:[%s3446_s21 + $0x1c8] sm:$0xff] %v1316_v27  ;;  %2005 = vrcp.f32 %v1113_v8  ;;  %v4186_v37 = vld [vmem:[#allocation47_spill] sm:$0xff]  ;;  %v4187_v27 = vld [vmem:[#allocation48_spill] sm:$0xff] }
 0x1fb   : > { %v1994_v10 = vpop.eup %1993  ;;  %v1317_v57 = vmul.f32 %v1992_v12, %v4172_v60  ;;  %v1318_v40 = vmul.f32 %v1992_v12, %v4173_v51 }
 0x1fc   : > { %v1319_v9 = vmul.f32 %v1994_v10, %v4174_v17  ;;  %v1320_v28 = vmul.f32 %v1994_v10, %v4175_v55  ;;  %v1116_v36 = vpop.xlane.xlu1 %1115  ;;  %v1119_v7 = vpop.xlane.xlu0 %1118 }
 0x1fd   : > { %1445 = vst [vmem:[%s3446_s21 + $0x1d0] sm:$0xff] %v1317_v57  ;;  %1446 = vst [vmem:[%s3446_s21 + $0x1d8] sm:$0xff] %v1318_v40  ;;  %2007 = vrcp.f32 %v1116_v36  ;;  %v4188_v57 = vld [vmem:[#allocation45_spill] sm:$0xff]  ;;  %v4189_v40 = vld [vmem:[#allocation46_spill] sm:$0xff] }
 0x1fe   : > { %v1996_v56 = vpop.eup %1995  ;;  %1447 = vst [vmem:[%s3446_s21 + $0x1e0] sm:$0xff] %v1319_v9  ;;  %1448 = vst [vmem:[%s3446_s21 + $0x1e8] sm:$0xff] %v1320_v28  ;;  %2009 = vrcp.f32 %v1119_v7  ;;  %v4190_v9 = vld [vmem:[#allocation51_spill] sm:$0xff]  ;;  %v4191_v28 = vld [vmem:[#allocation52_spill] sm:$0xff] }
 0x1ff   : > { %v1998_v46 = vpop.eup %1997  ;;  %v1321_v23 = vmul.f32 %v1996_v56, %v4176_v16  ;;  %v1322_v15 = vmul.f32 %v1996_v56, %v4177_v4 }
 0x200   : > { %v1323_v44 = vmul.f32 %v1998_v46, %v4178_v20  ;;  %v1324_v35 = vmul.f32 %v1998_v46, %v4179_v13  ;;  %v1122_v6 = vpop.xlane.xlu1 %1121  ;;  %v1125_v18 = vpop.xlane.xlu0 %1124 }
 0x201   : > { %1449 = vst [vmem:[%s3446_s21 + $0x1f0] sm:$0xff] %v1321_v23  ;;  %1450 = vst [vmem:[%s3446_s21 + $0x1f8] sm:$0xff] %v1322_v15  ;;  %2011 = vrcp.f32 %v1122_v6  ;;  %v4192_v23 = vld [vmem:[#allocation49_spill] sm:$0xff]  ;;  %v4193_v15 = vld [vmem:[#allocation50_spill] sm:$0xff] }
 0x202   : > { %v2000_v0 = vpop.eup %1999  ;;  %1451 = vst [vmem:[%s3446_s21 + $0x200] sm:$0xff] %v1323_v44  ;;  %1452 = vst [vmem:[%s3446_s21 + $0x208] sm:$0xff] %v1324_v35  ;;  %2013 = vrcp.f32 %v1125_v18  ;;  %v4194_v44 = vld [vmem:[#allocation55_spill] sm:$0xff]  ;;  %v4195_v35 = vld [vmem:[#allocation56_spill] sm:$0xff] }
 0x203   : > { %v2002_v42 = vpop.eup %2001  ;;  %v1325_v59 = vmul.f32 %v2000_v0, %v4180_v2  ;;  %v1326_v30 = vmul.f32 %v2000_v0, %v4181_v48 }
 0x204   : > { %v1327_v52 = vmul.f32 %v2002_v42, %v4182_v29  ;;  %v1328_v19 = vmul.f32 %v2002_v42, %v4183_v21  ;;  %v1128_v34 = vpop.xlane.xlu1 %1127  ;;  %v1131_v24 = vpop.xlane.xlu0 %1130 }
 0x205   : > { %1453 = vst [vmem:[%s3446_s21 + $0x210] sm:$0xff] %v1325_v59  ;;  %1454 = vst [vmem:[%s3446_s21 + $0x218] sm:$0xff] %v1326_v30  ;;  %2015 = vrcp.f32 %v1128_v34  ;;  %v4196_v59 = vld [vmem:[#allocation53_spill] sm:$0xff]  ;;  %v4197_v30 = vld [vmem:[#allocation54_spill] sm:$0xff] }
 0x206   : > { %v2004_v5 = vpop.eup %2003  ;;  %1455 = vst [vmem:[%s3446_s21 + $0x220] sm:$0xff] %v1327_v52  ;;  %1456 = vst [vmem:[%s3446_s21 + $0x228] sm:$0xff] %v1328_v19  ;;  %2017 = vrcp.f32 %v1131_v24  ;;  %v4198_v52 = vld [vmem:[#allocation59_spill] sm:$0xff]  ;;  %v4199_v19 = vld [vmem:[#allocation60_spill] sm:$0xff] }
 0x207   : > { %v2006_v62 = vpop.eup %2005  ;;  %v1329_v3 = vmul.f32 %v2004_v5, %v4184_v26  ;;  %v1330_v63 = vmul.f32 %v2004_v5, %v4185_v14 }
 0x208   : > { %v1331_v31 = vmul.f32 %v2006_v62, %v4186_v37  ;;  %v1332_v45 = vmul.f32 %v2006_v62, %v4187_v27  ;;  %v1134_v8 = vpop.xlane.xlu1 %1133  ;;  %v1137_v12 = vpop.xlane.xlu0 %1136 }
 0x209   : > { %1457 = vst [vmem:[%s3446_s21 + $0x230] sm:$0xff] %v1329_v3  ;;  %1458 = vst [vmem:[%s3446_s21 + $0x238] sm:$0xff] %v1330_v63  ;;  %2019 = vrcp.f32 %v1134_v8  ;;  %v4200_v3 = vld [vmem:[#allocation57_spill] sm:$0xff]  ;;  %v4201_v63 = vld [vmem:[#allocation58_spill] sm:$0xff] }
 0x20a   : > { %v2008_v10 = vpop.eup %2007  ;;  %1459 = vst [vmem:[%s3446_s21 + $0x240] sm:$0xff] %v1331_v31  ;;  %1460 = vst [vmem:[%s3446_s21 + $0x248] sm:$0xff] %v1332_v45  ;;  %2021 = vrcp.f32 %v1137_v12  ;;  %v4202_v31 = vld [vmem:[#allocation63_spill] sm:$0xff]  ;;  %v4203_v45 = vld [vmem:[#allocation64_spill] sm:$0xff] }
 0x20b   : > { %v2010_v60 = vpop.eup %2009  ;;  %v1333_v51 = vmul.f32 %v2008_v10, %v4188_v57  ;;  %v1334_v17 = vmul.f32 %v2008_v10, %v4189_v40 }
 0x20c   : > { %v1335_v55 = vmul.f32 %v2010_v60, %v4190_v9  ;;  %v1336_v36 = vmul.f32 %v2010_v60, %v4191_v28  ;;  %v1140_v7 = vpop.xlane.xlu1 %1139  ;;  %v1143_v56 = vpop.xlane.xlu0 %1142 }
 0x20d   : > { %1461 = vst [vmem:[%s3446_s21 + $0x250] sm:$0xff] %v1333_v51  ;;  %1462 = vst [vmem:[%s3446_s21 + $0x258] sm:$0xff] %v1334_v17  ;;  %2023 = vrcp.f32 %v1140_v7  ;;  %v4204_v51 = vld [vmem:[#allocation61_spill] sm:$0xff]  ;;  %v4205_v17 = vld [vmem:[#allocation62_spill] sm:$0xff] }
 0x20e   : > { %v2012_v46 = vpop.eup %2011  ;;  %1463 = vst [vmem:[%s3446_s21 + $0x260] sm:$0xff] %v1335_v55  ;;  %1464 = vst [vmem:[%s3446_s21 + $0x268] sm:$0xff] %v1336_v36  ;;  %2025 = vrcp.f32 %v1143_v56  ;;  %v4206_v55 = vld [vmem:[#allocation66_spill] sm:$0xff]  ;;  %v4207_v36 = vld [vmem:[#allocation67_spill] sm:$0xff] }
 0x20f   : > { %v2014_v16 = vpop.eup %2013  ;;  %v1337_v4 = vmul.f32 %v2012_v46, %v4192_v23  ;;  %v1338_v20 = vmul.f32 %v2012_v46, %v4193_v15  ;;  %v4208_v15 = vld [vmem:[#allocation65_spill] sm:$0xff] }
 0x210   : > { %v1339_v13 = vmul.f32 %v2014_v16, %v4194_v44  ;;  %v1340_v6 = vmul.f32 %v2014_v16, %v4195_v35  ;;  %v1146_v18 = vpop.xlane.xlu1 %1145  ;;  %v1149_v0 = vpop.xlane.xlu0 %1148  ;;  %v4209_v44 = vld [vmem:[#allocation70_spill] sm:$0xff]  ;;  %v4210_v35 = vld [vmem:[#allocation71_spill] sm:$0xff] }
 0x211   : > { %1465 = vst [vmem:[%s3446_s21 + $0x270] sm:$0xff] %v1337_v4  ;;  %1466 = vst [vmem:[%s3446_s21 + $0x278] sm:$0xff] %v1338_v20  ;;  %2027 = vrcp.f32 %v1146_v18 }
 0x212   : > { %v2016_v42 = vpop.eup %2015  ;;  %1467 = vst [vmem:[%s3446_s21 + $0x280] sm:$0xff] %v1339_v13  ;;  %1468 = vst [vmem:[%s3446_s21 + $0x288] sm:$0xff] %v1340_v6  ;;  %2029 = vrcp.f32 %v1149_v0 }
 0x213   : > { %v2018_v2 = vpop.eup %2017  ;;  %v1341_v48 = vmul.f32 %v2016_v42, %v4196_v59  ;;  %v1342_v29 = vmul.f32 %v2016_v42, %v4197_v30 }
 0x214   : > { %v1343_v21 = vmul.f32 %v2018_v2, %v4198_v52  ;;  %v1344_v34 = vmul.f32 %v2018_v2, %v4199_v19  ;;  %v1152_v24 = vpop.xlane.xlu1 %1151  ;;  %v1155_v5 = vpop.xlane.xlu0 %1154  ;;  %v4211_v2 = vld [vmem:[#allocation68_spill] sm:$0xff] }
 0x215   : > { %1469 = vst [vmem:[%s3446_s21 + $0x290] sm:$0xff] %v1341_v48  ;;  %1470 = vst [vmem:[%s3446_s21 + $0x298] sm:$0xff] %v1342_v29  ;;  %2031 = vrcp.f32 %v1152_v24  ;;  %v4212_v48 = vld [vmem:[#allocation69_spill] sm:$0xff] }
 0x216   : > { %v2020_v62 = vpop.eup %2019  ;;  %1471 = vst [vmem:[%s3446_s21 + $0x2a0] sm:$0xff] %v1343_v21  ;;  %1472 = vst [vmem:[%s3446_s21 + $0x2a8] sm:$0xff] %v1344_v34  ;;  %2033 = vrcp.f32 %v1155_v5  ;;  %v4213_v29 = vld [vmem:[#allocation73_spill] sm:$0xff]  ;;  %v4214_v21 = vld [vmem:[#allocation74_spill] sm:$0xff] }
 0x217   : > { %v2022_v26 = vpop.eup %2021  ;;  %v1345_v14 = vmul.f32 %v2020_v62, %v4200_v3  ;;  %v1346_v37 = vmul.f32 %v2020_v62, %v4201_v63  ;;  %v4215_v3 = vld [vmem:[#allocation72_spill] sm:$0xff] }
 0x218   : > { %v1347_v27 = vmul.f32 %v2022_v26, %v4202_v31  ;;  %v1348_v8 = vmul.f32 %v2022_v26, %v4203_v45  ;;  %v1158_v12 = vpop.xlane.xlu1 %1157  ;;  %v1161_v10 = vpop.xlane.xlu0 %1160 }
 0x219   : > { %1473 = vst [vmem:[%s3446_s21 + $0x2b0] sm:$0xff] %v1345_v14  ;;  %1474 = vst [vmem:[%s3446_s21 + $0x2b8] sm:$0xff] %v1346_v37  ;;  %2035 = vrcp.f32 %v1158_v12 }
 0x21a   : > { %v2024_v60 = vpop.eup %2023  ;;  %1475 = vst [vmem:[%s3446_s21 + $0x2c0] sm:$0xff] %v1347_v27  ;;  %1476 = vst [vmem:[%s3446_s21 + $0x2c8] sm:$0xff] %v1348_v8  ;;  %2037 = vrcp.f32 %v1161_v10 }
 0x21b   : > { %v2026_v57 = vpop.eup %2025  ;;  %v1349_v40 = vmul.f32 %v2024_v60, %v4204_v51  ;;  %v1350_v9 = vmul.f32 %v2024_v60, %v4205_v17 }
 0x21c   : > { %v1351_v28 = vmul.f32 %v2026_v57, %v4206_v55  ;;  %v1352_v7 = vmul.f32 %v2026_v57, %v4207_v36  ;;  %v1164_v56 = vpop.xlane.xlu1 %1163  ;;  %v1167_v46 = vpop.xlane.xlu0 %1166 }
 0x21d   : > { %1477 = vst [vmem:[%s3446_s21 + $0x2d0] sm:$0xff] %v1349_v40  ;;  %1478 = vst [vmem:[%s3446_s21 + $0x2d8] sm:$0xff] %v1350_v9  ;;  %2039 = vrcp.f32 %v1164_v56 }
 0x21e   : > { %v2028_v16 = vpop.eup %2027  ;;  %1479 = vst [vmem:[%s3446_s21 + $0x2e0] sm:$0xff] %v1351_v28  ;;  %1480 = vst [vmem:[%s3446_s21 + $0x2e8] sm:$0xff] %v1352_v7  ;;  %2041 = vrcp.f32 %v1167_v46  ;;  %v4217_v7 = vld [vmem:[#allocation75_spill] sm:$0xff]  ;;  %v4218_v46 = vld [vmem:[#allocation77_spill] sm:$0xff] }
 0x21f   : > { %v2030_v23 = vpop.eup %2029  ;;  %v1353_v4 = vmul.f32 %v2028_v16, %v3311_v61  ;;  %v1354_v20 = vmul.f32 %v2028_v16, %v4208_v15 }
 0x220   : > { %v1355_v13 = vmul.f32 %v2030_v23, %v4209_v44  ;;  %v1356_v6 = vmul.f32 %v2030_v23, %v4210_v35  ;;  %v1170_v18 = vpop.xlane.xlu1 %1169  ;;  %v1173_v0 = vpop.xlane.xlu0 %1172  ;;  %v4221_v44 = vld [vmem:[#allocation80_spill] sm:$0xff]  ;;  %v4222_v35 = vld [vmem:[#allocation81_spill] sm:$0xff] }
 0x221   : > { %1481 = vst [vmem:[%s3446_s21 + $0x2f0] sm:$0xff] %v1353_v4  ;;  %1482 = vst [vmem:[%s3446_s21 + $0x2f8] sm:$0xff] %v1354_v20  ;;  %2043 = vrcp.f32 %v1170_v18  ;;  %v4223_v18 = vld [vmem:[#allocation83_spill] sm:$0xff] }
 0x222   : > { %v2032_v42 = vpop.eup %2031  ;;  %1483 = vst [vmem:[%s3446_s21 + $0x300] sm:$0xff] %v1355_v13  ;;  %1484 = vst [vmem:[%s3446_s21 + $0x308] sm:$0xff] %v1356_v6  ;;  %2045 = vrcp.f32 %v1173_v0 }
 0x223   : > { %v2034_v61 = vpop.eup %2033  ;;  %v1357_v59 = vmul.f32 %v2032_v42, %v4211_v2  ;;  %v1358_v30 = vmul.f32 %v2032_v42, %v4212_v48 }
 0x224   : > { %v1359_v52 = vmul.f32 %v2034_v61, %v4213_v29  ;;  %v1360_v19 = vmul.f32 %v2034_v61, %v4214_v21  ;;  %v1176_v34 = vpop.xlane.xlu1 %1175  ;;  %v1179_v24 = vpop.xlane.xlu0 %1178  ;;  %v4224_v61 = vld [vmem:[#allocation82_spill] sm:$0xff] }
 0x225   : > { %1485 = vst [vmem:[%s3446_s21 + $0x310] sm:$0xff] %v1357_v59  ;;  %1486 = vst [vmem:[%s3446_s21 + $0x318] sm:$0xff] %v1358_v30  ;;  %2047 = vrcp.f32 %v1176_v34 }
 0x226   : > { %v2036_v5 = vpop.eup %2035  ;;  %1487 = vst [vmem:[%s3446_s21 + $0x320] sm:$0xff] %v1359_v52  ;;  %1488 = vst [vmem:[%s3446_s21 + $0x328] sm:$0xff] %v1360_v19  ;;  %2049 = vrcp.f32 %v1179_v24 }
 0x227   : > { %v2038_v62 = vpop.eup %2037  ;;  %v1361_v26 = vmul.f32 %v2036_v5, %v3343_v22  ;;  %v1362_v14 = vmul.f32 %v2036_v5, %v4215_v3 }
 0x228   : > { %v1363_v63 = vmul.f32 %v2038_v62, %v3368_v49  ;;  %v1364_v37 = vmul.f32 %v2038_v62, %v3372_v43  ;;  %v1182_v31 = vpop.xlane.xlu1 %1181  ;;  %v1185_v27 = vpop.xlane.xlu0 %1184 }
 0x229   : > { %1489 = vst [vmem:[%s3446_s21 + $0x330] sm:$0xff] %v1361_v26  ;;  %1490 = vst [vmem:[%s3446_s21 + $0x338] sm:$0xff] %v1362_v14  ;;  %2051 = vrcp.f32 %v1182_v31 }
 0x22a   : > { %v2040_v45 = vpop.eup %2039  ;;  %1491 = vst [vmem:[%s3446_s21 + $0x340] sm:$0xff] %v1363_v63  ;;  %1492 = vst [vmem:[%s3446_s21 + $0x348] sm:$0xff] %v1364_v37  ;;  %2053 = vrcp.f32 %v1185_v27 }
 0x22b   : > { %v2042_v22 = vpop.eup %2041  ;;  %v1365_v8 = vmul.f32 %v2040_v45, %v3360_v32  ;;  %v1366_v49 = vmul.f32 %v2040_v45, %v3366_v54 }
 0x22c   : > { %v1367_v43 = vmul.f32 %v2042_v22, %v3384_v25  ;;  %v1368_v12 = vmul.f32 %v2042_v22, %v3386_v41  ;;  %v1188_v10 = vpop.xlane.xlu1 %1187  ;;  %v1191_v60 = vpop.xlane.xlu0 %1190 }
 0x22d   : > { %1493 = vst [vmem:[%s3446_s21 + $0x350] sm:$0xff] %v1365_v8  ;;  %1494 = vst [vmem:[%s3446_s21 + $0x358] sm:$0xff] %v1366_v49  ;;  %2055 = vrcp.f32 %v1188_v10 }
 0x22e   : > { %v2044_v57 = vpop.eup %2043  ;;  %1495 = vst [vmem:[%s3446_s21 + $0x360] sm:$0xff] %v1367_v43  ;;  %1496 = vst [vmem:[%s3446_s21 + $0x368] sm:$0xff] %v1368_v12  ;;  %2057 = vrcp.f32 %v1191_v60 }
 0x22f   : > { %v2046_v32 = vpop.eup %2045  ;;  %v1369_v54 = vmul.f32 %v2044_v57, %v3376_v1  ;;  %v1370_v25 = vmul.f32 %v2044_v57, %v3382_v53 }
 0x230   : > { %v1371_v41 = vmul.f32 %v2046_v32, %v3394_v33  ;;  %v1372_v51 = vmul.f32 %v2046_v32, %v3396_v58  ;;  %v1194_v40 = vpop.xlane.xlu1 %1193  ;;  %v4216_v58 = vld [vmem:[#allocation76_spill] sm:$0xff] }
 0x231   : > { %1497 = vst [vmem:[%s3446_s21 + $0x370] sm:$0xff] %v1369_v54  ;;  %1498 = vst [vmem:[%s3446_s21 + $0x378] sm:$0xff] %v1370_v25  ;;  %2059 = vrcp.f32 %v1194_v40 }
 0x232   : > { %v2048_v17 = vpop.eup %2047  ;;  %1499 = vst [vmem:[%s3446_s21 + $0x380] sm:$0xff] %v1371_v41  ;;  %1500 = vst [vmem:[%s3446_s21 + $0x388] sm:$0xff] %v1372_v51 }
 0x233   : > { %v2050_v9 = vpop.eup %2049  ;;  %v1373_v1 = vmul.f32 %v2048_v17, %v3392_v50  ;;  %v1374_v53 = vmul.f32 %v2048_v17, %v3398_v47  ;;  %v4219_v47 = vld [vmem:[#allocation78_spill] sm:$0xff] }
 0x234   : > { %v1375_v33 = vmul.f32 %v2050_v9, %v3406_v39  ;;  %v1376_v55 = vmul.f32 %v2050_v9, %v4216_v58  ;;  %v4220_v39 = vld [vmem:[#allocation79_spill] sm:$0xff] }
 0x235   : > { %1501 = vst [vmem:[%s3446_s21 + $0x390] sm:$0xff] %v1373_v1  ;;  %1502 = vst [vmem:[%s3446_s21 + $0x398] sm:$0xff] %v1374_v53 }
 0x236   : > { %v2052_v28 = vpop.eup %2051  ;;  %1503 = vst [vmem:[%s3446_s21 + $0x3a0] sm:$0xff] %v1375_v33  ;;  %1504 = vst [vmem:[%s3446_s21 + $0x3a8] sm:$0xff] %v1376_v55 }
 0x237   : > { %v2054_v36 = vpop.eup %2053  ;;  %v1377_v56 = vmul.f32 %v2052_v28, %v4217_v7  ;;  %v1378_v50 = vmul.f32 %v2052_v28, %v4218_v46 }
 0x238   : > { %v1379_v16 = vmul.f32 %v2054_v36, %v4219_v47  ;;  %v1380_v23 = vmul.f32 %v2054_v36, %v4220_v39 }
 0x239   : > { %1505 = vst [vmem:[%s3446_s21 + $0x3b0] sm:$0xff] %v1377_v56  ;;  %1506 = vst [vmem:[%s3446_s21 + $0x3b8] sm:$0xff] %v1378_v50 }
 0x23a   : > { %v2056_v4 = vpop.eup %2055  ;;  %1507 = vst [vmem:[%s3446_s21 + $0x3c0] sm:$0xff] %v1379_v16  ;;  %1508 = vst [vmem:[%s3446_s21 + $0x3c8] sm:$0xff] %v1380_v23 }
 0x23b   : > { %v2058_v15 = vpop.eup %2057  ;;  %v1381_v20 = vmul.f32 %v2056_v4, %v3420_v38  ;;  %v1382_v13 = vmul.f32 %v2056_v4, %v4221_v44 }
 0x23c   : > { %v1383_v6 = vmul.f32 %v2058_v15, %v4222_v35  ;;  %v1384_v0 = vmul.f32 %v2058_v15, %v4223_v18 }
 0x23d   : > { %1509 = vst [vmem:[%s3446_s21 + $0x3d0] sm:$0xff] %v1381_v20  ;;  %1510 = vst [vmem:[%s3446_s21 + $0x3d8] sm:$0xff] %v1382_v13 }
 0x23e   : > { %v2060_v42 = vpop.eup %2059  ;;  %1511 = vst [vmem:[%s3446_s21 + $0x3e0] sm:$0xff] %v1383_v6  ;;  %1512 = vst [vmem:[%s3446_s21 + $0x3e8] sm:$0xff] %v1384_v0 }
 0x23f   : > { %v1385_v38 = vmul.f32 %v2060_v42, %v3432_v11  ;;  %v1386_v2 = vmul.f32 %v2060_v42, %v4224_v61 }
 0x241   : > { %1513 = vst [vmem:[%s3446_s21 + $0x3f0] sm:$0xff] %v1385_v38  ;;  %1514 = vst [vmem:[%s3446_s21 + $0x3f8] sm:$0xff] %v1386_v2 }
 0x242   : > { %2102 = shalt.err (!%p2099_p10)
}
 0x243   : > { %s2103_s20 = scalar_lea.hbm %s3703_s9, 16384  ;;  %s2107_s26 = scalar_lea.hbm %s3754_s2, 32768 }
 0x244   : > { %p2104_p0 = scmp.ne.s32.totalorder %s3703_s9, %s2103_s20  ;;  %p2108_p1 = scmp.lt.s32.totalorder %s3703_s9, %s3754_s2 }
 0x245   : > { %p2109_p3 = scmp.lt.s32.totalorder %s2107_s26, %s2103_s20 }
 0x246   : > { %p2105_p2 = pnand %p2104_p0, %p4225_p12 }
 0x247   : > { %p2110_p6 = por %p2109_p3, %p2108_p1 }
 0x248   : > { %p2106_p9 = pneg %p2105_p2 }
 0x24a   : > { %p2111_p11 = pnand %p2110_p6, %p2106_p9 }
 0x24c   : > { %2114 = shalt.err (!%p2111_p11)
}
 0x24d   : > { %s2159_s6 = smov 256   ;;  %s2160_s29 = smov 16  }
 0x24e   : > { %1627 = dma.vmem_to_hbm [thread:$0]  (%p4225_p12), %s3705_s5, 16384, %s3703_s9, %s1516_s0, %s2159_s6, %s2159_s6, %s2160_s29  }
 0x24f PF: > { %s1545_s3 = sand.u32 1, %s2141_s11   ;;  %p4226_p13 = scmp.ne.s32.totalorder %s3914_s23, 0 }
 0x250   : > { %p4227_p4 = scmp.ge.s32.totalorder %s2153_s14, 2  ;;  %s1546_s21 = scalar_lea.sflag [#allocation5], %s1545_s3 }
 0x252   : > { %p1634_p5 = pnand %p4227_p4, %p4226_p13 }
 0x254   : > { %p1635_p7 = pneg %p1634_p5 }
 0x256   : > { %2136 = dma.done.wait (%p1635_p7), %s1546_s21, 16384  }
 0x257   : > { %2138 = vsyncadd (%p1635_p7), %s1546_s21, 4294950912  ;;  %p16_p8 = scmp.ge.s32.totalorder %s2204_s16, 4   ;;  %s4228_s11 = smov %s2145_s12 }
 0x258   : > { %s4229_s12 = smov %s2149_s13  ;;  %s4230_s13 = smov %s2216_s19 }
 0x259   : > { %s4231_s14 = smov %s2204_s16  ;;  %18 = sbr.rel (!%p16_p8) target bundleno = 7 (0x7), region = 73 }
 0x25e   :  { %1551 = vsyncpa [#allocation4], 1 }
 0x25f   :  { %1553 = vsyncpa [#allocation4 + $0x1], 1 }
 0x260   :  { %1554 = vsyncpa [#allocation5], 1 }
 0x261   :  { %1556 = vsyncpa [#allocation5 + $0x1], 1 }

</bundles_post_ra>
